<compile_context>
chip_gen: v7x
topology: tpu7x:2x2x1
jax: 0.10.0
libtpu: 0.0.40
codegen_flags: <defaults>
</compile_context>

<pallas_src>
import functools

import jax
import jax.numpy as jnp
from jax.experimental import pallas as pl
from jax.experimental.pallas import tpu as pltpu


def _round_up(x, m):
    return (x + m - 1) // m * m


# ----------------------------------------------------------------------------
# Fused kernel: num_gc_layers x (WGINConv -> MLP -> BatchNorm1d -> ReLU?) + add-pool.
# Single block (no grid): adjacency, weights and activations stay resident in VMEM.
# ----------------------------------------------------------------------------
def tu_encoder_kernel(adj_ref, x0_ref, w10_ref, w1s_ref, w2s_ref, prm_ref, pool_ref,
                      xpool_ref, xnode_ref, *,
                      num_layers: int, n_valid: int, bn_eps: float, use_bf16: bool):
    mxu_dt = jnp.bfloat16 if use_bf16 else jnp.float32

    adj = adj_ref[...]                       # (Np, Np), A[dst,src] with (1+eps) folded on diag
    h_in = x0_ref[...]                       # (Np, Din_pad), already in MXU dtype
    n_pad = adj.shape[0]

    # (Np, 1) mask of real nodes -> exact BatchNorm stats despite row padding.
    row_ids = jax.lax.broadcasted_iota(jnp.int32, (n_pad, 1), 0)
    mask = (row_ids < n_valid).astype(jnp.float32)
    inv_n = jnp.float32(1.0 / n_valid)

    x_final = None
    for l in range(num_layers):              # static unroll (num_gc_layers is small)
        # ---- WGINConv aggregation: (A + (1+eps)I) @ x  (self term folded into adj)
        agg = jnp.dot(adj, h_in, preferred_element_type=jnp.float32)

        # ---- GIN MLP: Linear -> ReLU -> Linear (MXU feeds in mxu_dt, f32 accumulate)
        w1 = w10_ref[...] if l == 0 else w1s_ref[l - 1]
        h1 = jnp.maximum(
            jnp.dot(agg.astype(mxu_dt), w1, preferred_element_type=jnp.float32)
            + prm_ref[l, 0:1, :], 0.0)
        h2 = (jnp.dot(h1.astype(mxu_dt), w2s_ref[l], preferred_element_type=jnp.float32)
              + prm_ref[l, 1:2, :])

        # ---- BatchNorm1d, training-mode biased stats over REAL nodes only:
        #      single masked pass, E[x^2] - E[x]^2.
        h2m = h2 * mask
        mean = jnp.sum(h2m, axis=0, keepdims=True) * inv_n
        ex2 = jnp.sum(h2m * h2, axis=0, keepdims=True) * inv_n
        var = ex2 - mean * mean
        y = (h2 - mean) * jax.lax.rsqrt(var + bn_eps) * prm_ref[l, 2:3, :] + prm_ref[l, 3:4, :]

        # ---- ReLU for all but the last layer; dropout(p=0.0) is identity
        if l < num_layers - 1:
            y = jnp.maximum(y, 0.0)
            h_in = y.astype(mxu_dt)
        x_final = y

    xnode_ref[...] = x_final
    # ---- global_add_pool as one-hot graph-assignment matmul (MXU feeds, f32 acc)
    xpool_ref[...] = jnp.dot(pool_ref[...], x_final.astype(mxu_dt),
                             preferred_element_type=jnp.float32)


# ----------------------------------------------------------------------------
# Parameter packing: decoupled input/emb padding, stacked layer slabs.
# ----------------------------------------------------------------------------
def pack_params(params, num_features, emb_dim, mxu_dtype):
    num_layers = len(params)
    d_in = _round_up(num_features, 128)       # layer-0 input width only
    d = _round_up(emb_dim, 128)               # every other dimension
    w10 = (jnp.zeros((d_in, d), jnp.float32)
           .at[:num_features, :emb_dim].set(params[0]["w1"]))
    w1s = jnp.zeros((max(num_layers - 1, 1), d, d), jnp.float32)
    w2s = jnp.zeros((num_layers, d, d), jnp.float32)
    prm = jnp.zeros((num_layers, 8, d), jnp.float32)   # rows: b1, b2, gamma, beta
    for l, p in enumerate(params):
        if l >= 1:
            w1s = w1s.at[l - 1, :emb_dim, :emb_dim].set(p["w1"])
        w2s = w2s.at[l, :emb_dim, :emb_dim].set(p["w2"])
        prm = prm.at[l, 0, :emb_dim].set(p["b1"].reshape(-1))
        prm = prm.at[l, 1, :emb_dim].set(p["b2"].reshape(-1))
        prm = prm.at[l, 2, :emb_dim].set(p["gamma"].reshape(-1))
        prm = prm.at[l, 3, :emb_dim].set(p["beta"].reshape(-1))
    return (w10.astype(mxu_dtype), w1s.astype(mxu_dtype), w2s.astype(mxu_dtype),
            prm, d_in, d)


# ----------------------------------------------------------------------------
# TUEncoder forward wrapper (graph densification in JAX, compute in one kernel).
# ----------------------------------------------------------------------------
@functools.partial(jax.jit,
                   static_argnames=("num_graphs", "gin_eps", "bn_eps", "use_bf16"))
def tu_encoder_forward(batch, x, edge_index, params, *, num_graphs,
                       edge_weight=None, gin_eps=0.0, bn_eps=1e-5, use_bf16=True):
    n, num_features = x.shape
    emb_dim = params[0]["w2"].shape[1]
    num_layers = len(params)
    mxu_dt = jnp.bfloat16 if use_bf16 else jnp.float32

    w10, w1s, w2s, prm, d_in_pad, d_pad = pack_params(params, num_features, emb_dim,
                                                      mxu_dt)
    n_pad = _round_up(n, 128)
    g_pad = _round_up(num_graphs, 8)

    # Dense adjacency A[dst,src] built directly in the MXU dtype; the GIN self term
    # (1+eps) is folded onto the diagonal so the kernel's matmul covers it.
    # (Duplicate-edge accumulation happens in mxu_dt; exact for typical TU graphs.)
    src, dst = edge_index[0], edge_index[1]
    if edge_weight is None:
        w = jnp.ones((src.shape[0],), mxu_dt)
    else:
        w = edge_weight.astype(mxu_dt)
    diag = jnp.arange(n, dtype=jnp.int32)
    adj = (jnp.zeros((n_pad, n_pad), mxu_dt)
           .at[dst, src].add(w)
           .at[diag, diag].add(jnp.asarray(1.0 + gin_eps, mxu_dt)))

    # Zero-padded, lane-dense node features (MXU dtype).
    x_pad = (jnp.zeros((n_pad, d_in_pad), mxu_dt)
             .at[:n, :num_features].set(x.astype(mxu_dt)))

    # One-hot graph assignment for add pooling (exact in bf16); padded nodes unused.
    pool_mat = (jnp.zeros((g_pad, n_pad), mxu_dt)
                .at[batch, jnp.arange(n)].set(jnp.asarray(1.0, mxu_dt)))

    kernel = functools.partial(tu_encoder_kernel, num_layers=num_layers, n_valid=n,
                               bn_eps=float(bn_eps), use_bf16=use_bf16)

    # Chip-aware VMEM budget: ~cap/8 headroom (56 MiB on v7x, ~112 MiB on v5e/v6e).
    try:
        cap = int(pltpu.get_tpu_info().vmem_capacity_bytes)
    except Exception:
        cap = 64 << 20
    head = max(8 << 20, cap // 8)
    resident = (adj.nbytes + x_pad.nbytes + w10.nbytes + w1s.nbytes + w2s.nbytes
                + prm.nbytes + pool_mat.nbytes
                + 4 * n_pad * d_pad * 4                       # f32 temporaries
                + n_pad * d_pad * 4 + g_pad * d_pad * 4)      # outputs
    vmem_limit = int(min(max(2 * resident + (8 << 20), 32 << 20), cap - head))

    xpool_p, xnode_p = pl.pallas_call(
        kernel,
        out_shape=(jax.ShapeDtypeStruct((g_pad, d_pad), jnp.float32),
                   jax.ShapeDtypeStruct((n_pad, d_pad), jnp.float32)),
        compiler_params=pltpu.CompilerParams(vmem_limit_bytes=vmem_limit),
    )(adj, x_pad, w10, w1s, w2s, prm, pool_mat)

    return xpool_p[:num_graphs, :emb_dim], xnode_p[:n, :emb_dim]


# ----------------------------------------------------------------------------
# Deterministic parameter init (shapes follow TUEncoder.__init__).
# ----------------------------------------------------------------------------
def init_params(key, num_features, emb_dim, num_gc_layers):
    params = []
    for i in range(num_gc_layers):
        fin = num_features if i == 0 else emb_dim
        key, k1, k2 = jax.random.split(key, 3)
        params.append({
            "w1": jax.random.normal(k1, (fin, emb_dim), jnp.float32) * 0.1,
            "b1": jnp.zeros((emb_dim,), jnp.float32),
            "w2": jax.random.normal(k2, (emb_dim, emb_dim), jnp.float32) * 0.1,
            "b2": jnp.zeros((emb_dim,), jnp.float32),
            "gamma": jnp.ones((emb_dim,), jnp.float32),   # BatchNorm1d weight
            "beta": jnp.zeros((emb_dim,), jnp.float32),   # BatchNorm1d bias
        })
    return params


# ----------------------------------------------------------------------------
# Pure-JAX reference. use_bf16=False: exact f32 semantics of the PyTorch module.
# use_bf16=True: matched-precision reference (bf16 MXU feeds, f32 accumulation),
# mirroring the kernel's quantization points for a tight apples-to-apples check.
# ----------------------------------------------------------------------------
def reference_forward(batch, x, edge_index, params, *, num_graphs,
                      edge_weight=None, gin_eps=0.0, bn_eps=1e-5, use_bf16=False):
    mdt = jnp.bfloat16 if use_bf16 else jnp.float32
    prec = jax.lax.Precision.HIGHEST
    n = x.shape[0]
    src, dst = edge_index[0], edge_index[1]
    if edge_weight is None:
        w = jnp.ones((src.shape[0],), mdt)
    else:
        w = edge_weight.astype(mdt)
    adj = jnp.zeros((n, n), mdt).at[dst, src].add(w)
    xx = x.astype(mdt)
    L = len(params)
    for i, p in enumerate(params):
        agg = (jnp.dot(adj, xx, preferred_element_type=jnp.float32, precision=prec)
               + (1.0 + gin_eps) * xx.astype(jnp.float32))
        h1 = jnp.maximum(
            jnp.dot(agg.astype(mdt), p["w1"].astype(mdt),
                    preferred_element_type=jnp.float32, precision=prec) + p["b1"], 0.0)
        h2 = (jnp.dot(h1.astype(mdt), p["w2"].astype(mdt),
                      preferred_element_type=jnp.float32, precision=prec) + p["b2"])
        mean = h2.mean(0, keepdims=True)
        var = ((h2 - mean) ** 2).mean(0, keepdims=True)
        y = (h2 - mean) * jax.lax.rsqrt(var + bn_eps) * p["gamma"] + p["beta"]
        if i < L - 1:
            y = jnp.maximum(y, 0.0)
            xx = y.astype(mdt)
        else:
            xx = y
    pool = (jnp.arange(num_graphs)[:, None] == batch[None, :]).astype(mdt)
    xpool = jnp.dot(pool, xx.astype(mdt), preferred_element_type=jnp.float32,
                    precision=prec)
    return xpool, xx.astype(jnp.float32)


if __name__ == "__main__":
    key = jax.random.PRNGKey(0)

    # small synthetic graph batch: 2 graphs x 8 nodes, 8 input features
    num_nodes = 16
    num_features = 8
    emb_dim = 32
    num_gc_layers = 3
    num_graphs = 2

    key, kx, kw = jax.random.split(key, 3)
    x = jax.random.normal(kx, (num_nodes, num_features), jnp.float32)
    batch = jnp.concatenate([jnp.zeros(8, jnp.int32), jnp.ones(8, jnp.int32)])

    # ring edges within each graph (both directions); PyG convention: row0=src, row1=dst
    src_list, dst_list = [], []
    for g in range(num_graphs):
        base = g * 8
        for j in range(8):
            a, b = base + j, base + (j + 1) % 8
            src_list += [a, b]
            dst_list += [b, a]
    edge_index = jnp.array([src_list, dst_list], jnp.int32)
    edge_weight = jax.random.uniform(kw, (edge_index.shape[1],), jnp.float32, 0.5, 1.5)

    params = init_params(key, num_features, emb_dim, num_gc_layers)

    # ---- Semantics check: f32 MXU feeds vs. exact f32 reference (tight) ----------
    for ew in (None, edge_weight):
        xpool, xnode = tu_encoder_forward(batch, x, edge_index, params,
                                          num_graphs=num_graphs, edge_weight=ew,
                                          use_bf16=False)
        jax.block_until_ready((xpool, xnode))
        rp, rn = reference_forward(batch, x, edge_index, params,
                                   num_graphs=num_graphs, edge_weight=ew,
                                   use_bf16=False)
        assert xpool.shape == (num_graphs, emb_dim)
        assert xnode.shape == (num_nodes, emb_dim)
        assert jnp.allclose(xnode, rn, atol=2e-3, rtol=2e-3)
        assert jnp.allclose(xpool, rp, atol=5e-3, rtol=2e-3)

    # ---- Perf path check: bf16 MXU feeds vs. matched-precision reference ---------
    for ew in (None, edge_weight):
        xpool, xnode = tu_encoder_forward(batch, x, edge_index, params,
                                          num_graphs=num_graphs, edge_weight=ew,
                                          use_bf16=True)
        jax.block_until_ready((xpool, xnode))
        rp, rn = reference_forward(batch, x, edge_index, params,
                                   num_graphs=num_graphs, edge_weight=ew,
                                   use_bf16=True)
        assert jnp.allclose(xnode, rn, atol=3e-2, rtol=3e-2)
        assert jnp.allclose(xpool, rp, atol=1e-1, rtol=3e-2)

    print("KERNEL_OK")
</pallas_src>

<mosaic_0001>
module attributes {stable_mosaic.version = 11 : i64} {
  func.func private @main(%arg0: i32) attributes {dimension_semantics = [#tpu.dimension_semantics<core_parallel>], iteration_bounds = array<i64: 2>, tpu.core_type = #tpu.core_type<sc_scalar_subcore>, window_params = []} {
    return
  }
}

module attributes {stable_mosaic.version = 11 : i64} {
  func.func private @main(%arg0: i32) attributes {dimension_semantics = [#tpu.dimension_semantics<core_parallel>], iteration_bounds = array<i64: 2>, tpu.core_type = #tpu.core_type<sc_scalar_subcore>, window_params = []} {
    return
  }
}

module attributes {stable_mosaic.version = 11 : i64} {
  func.func @tu_encoder_kernel(%arg0: memref<128x128xf32, #tpu.memory_space<vmem>>, %arg1: memref<128x128xf32, #tpu.memory_space<vmem>>, %arg2: memref<128x128xf32, #tpu.memory_space<vmem>>, %arg3: memref<2x128x128xf32, #tpu.memory_space<vmem>>, %arg4: memref<3x128x128xf32, #tpu.memory_space<vmem>>, %arg5: memref<3x8x128xf32, #tpu.memory_space<vmem>>, %arg6: memref<8x128xf32, #tpu.memory_space<vmem>>, %arg7: memref<8x128xf32, #tpu.memory_space<vmem>>, %arg8: memref<128x128xf32, #tpu.memory_space<vmem>>) attributes {dimension_semantics = [], scalar_prefetch = 0 : i64, scratch_operands = 0 : i64, tpu.core_type = #tpu.core_type<tc>} {
    %c0 = arith.constant 0 : index
    %c0_0 = arith.constant 0 : index
    %0 = vector.load %arg0[%c0, %c0_0] : memref<128x128xf32, #tpu.memory_space<vmem>>, vector<128x128xf32>
    %c0_1 = arith.constant 0 : index
    %c0_2 = arith.constant 0 : index
    %1 = vector.load %arg1[%c0_1, %c0_2] : memref<128x128xf32, #tpu.memory_space<vmem>>, vector<128x128xf32>
    %2 = tpu.iota {dimensions = array<i32: 0>} : vector<128x1xi32>
    %c16_i32 = arith.constant 16 : i32
    %3 = vector.broadcast %c16_i32 : i32 to vector<128x1xi32>
    %4 = arith.cmpi slt, %2, %3 : vector<128x1xi32>
    %5 = arith.extui %4 : vector<128x1xi1> to vector<128x1xi32>
    %6 = arith.sitofp %5 : vector<128x1xi32> to vector<128x1xf32>
    %cst = arith.constant dense<0.000000e+00> : vector<128x128xf32>
    %7 = tpu.matmul %0, %1, %cst {dimension_numbers = #tpu.dot_dimension_numbers<[1], [0], [0], [1], [0, 0, 1, 1], [], []>} : vector<128x128xf32>, vector<128x128xf32>, vector<128x128xf32> -> vector<128x128xf32>
    %c0_3 = arith.constant 0 : index
    %c0_4 = arith.constant 0 : index
    %8 = vector.load %arg2[%c0_3, %c0_4] : memref<128x128xf32, #tpu.memory_space<vmem>>, vector<128x128xf32>
    %cst_5 = arith.constant dense<0.000000e+00> : vector<128x128xf32>
    %9 = tpu.matmul %7, %8, %cst_5 {dimension_numbers = #tpu.dot_dimension_numbers<[1], [0], [0], [1], [0, 0, 1, 1], [], []>} : vector<128x128xf32>, vector<128x128xf32>, vector<128x128xf32> -> vector<128x128xf32>
    %c0_6 = arith.constant 0 : index
    %c0_7 = arith.constant 0 : index
    %c0_8 = arith.constant 0 : index
    %10 = vector.load %arg5[%c0_6, %c0_7, %c0_8] : memref<3x8x128xf32, #tpu.memory_space<vmem>>, vector<1x1x128xf32>
    %11 = vector.shape_cast %10 : vector<1x1x128xf32> to vector<1x128xf32>
    %12 = vector.broadcast %11 : vector<1x128xf32> to vector<128x128xf32>
    %13 = arith.addf %9, %12 : vector<128x128xf32>
    %cst_9 = arith.constant 0.000000e+00 : f32
    %14 = vector.broadcast %cst_9 : f32 to vector<128x128xf32>
    %15 = arith.maximumf %13, %14 : vector<128x128xf32>
    %c0_10 = arith.constant 0 : index
    %c0_11 = arith.constant 0 : index
    %c0_12 = arith.constant 0 : index
    %16 = vector.load %arg4[%c0_10, %c0_11, %c0_12] : memref<3x128x128xf32, #tpu.memory_space<vmem>>, vector<1x128x128xf32>
    %17 = vector.shape_cast %16 : vector<1x128x128xf32> to vector<128x128xf32>
    %cst_13 = arith.constant dense<0.000000e+00> : vector<128x128xf32>
    %18 = tpu.matmul %15, %17, %cst_13 {dimension_numbers = #tpu.dot_dimension_numbers<[1], [0], [0], [1], [0, 0, 1, 1], [], []>} : vector<128x128xf32>, vector<128x128xf32>, vector<128x128xf32> -> vector<128x128xf32>
    %c0_14 = arith.constant 0 : index
    %c1 = arith.constant 1 : index
    %c0_15 = arith.constant 0 : index
    %19 = vector.load %arg5[%c0_14, %c1, %c0_15] : memref<3x8x128xf32, #tpu.memory_space<vmem>>, vector<1x1x128xf32>
    %20 = vector.shape_cast %19 : vector<1x1x128xf32> to vector<1x128xf32>
    %21 = vector.broadcast %20 : vector<1x128xf32> to vector<128x128xf32>
    %22 = arith.addf %18, %21 : vector<128x128xf32>
    %23 = vector.broadcast %6 : vector<128x1xf32> to vector<128x128xf32>
    %24 = arith.mulf %22, %23 : vector<128x128xf32>
    %cst_16 = arith.constant dense<0.000000e+00> : vector<128xf32>
    %25 = vector.multi_reduction <add>, %24, %cst_16 [0] : vector<128x128xf32> to vector<128xf32>
    %26 = vector.shape_cast %25 : vector<128xf32> to vector<1x128xf32>
    %cst_17 = arith.constant 6.250000e-02 : f32
    %27 = vector.broadcast %cst_17 : f32 to vector<1x128xf32>
    %28 = arith.mulf %26, %27 : vector<1x128xf32>
    %29 = arith.mulf %24, %22 : vector<128x128xf32>
    %cst_18 = arith.constant dense<0.000000e+00> : vector<128xf32>
    %30 = vector.multi_reduction <add>, %29, %cst_18 [0] : vector<128x128xf32> to vector<128xf32>
    %31 = vector.shape_cast %30 : vector<128xf32> to vector<1x128xf32>
    %cst_19 = arith.constant 6.250000e-02 : f32
    %32 = vector.broadcast %cst_19 : f32 to vector<1x128xf32>
    %33 = arith.mulf %31, %32 : vector<1x128xf32>
    %34 = arith.mulf %28, %28 : vector<1x128xf32>
    %35 = arith.subf %33, %34 : vector<1x128xf32>
    %36 = vector.broadcast %28 : vector<1x128xf32> to vector<128x128xf32>
    %37 = arith.subf %22, %36 : vector<128x128xf32>
    %cst_20 = arith.constant 9.99999974E-6 : f32
    %38 = vector.broadcast %cst_20 : f32 to vector<1x128xf32>
    %39 = arith.addf %35, %38 : vector<1x128xf32>
    %40 = math.rsqrt %39 : vector<1x128xf32>
    %41 = vector.broadcast %40 : vector<1x128xf32> to vector<128x128xf32>
    %42 = arith.mulf %37, %41 : vector<128x128xf32>
    %c0_21 = arith.constant 0 : index
    %c2 = arith.constant 2 : index
    %c0_22 = arith.constant 0 : index
    %43 = vector.load %arg5[%c0_21, %c2, %c0_22] : memref<3x8x128xf32, #tpu.memory_space<vmem>>, vector<1x1x128xf32>
    %44 = vector.shape_cast %43 : vector<1x1x128xf32> to vector<1x128xf32>
    %45 = vector.broadcast %44 : vector<1x128xf32> to vector<128x128xf32>
    %46 = arith.mulf %42, %45 : vector<128x128xf32>
    %c0_23 = arith.constant 0 : index
    %c3 = arith.constant 3 : index
    %c0_24 = arith.constant 0 : index
    %47 = vector.load %arg5[%c0_23, %c3, %c0_24] : memref<3x8x128xf32, #tpu.memory_space<vmem>>, vector<1x1x128xf32>
    %48 = vector.shape_cast %47 : vector<1x1x128xf32> to vector<1x128xf32>
    %49 = vector.broadcast %48 : vector<1x128xf32> to vector<128x128xf32>
    %50 = arith.addf %46, %49 : vector<128x128xf32>
    %cst_25 = arith.constant 0.000000e+00 : f32
    %51 = vector.broadcast %cst_25 : f32 to vector<128x128xf32>
    %52 = arith.maximumf %50, %51 : vector<128x128xf32>
    %cst_26 = arith.constant dense<0.000000e+00> : vector<128x128xf32>
    %53 = tpu.matmul %0, %52, %cst_26 {dimension_numbers = #tpu.dot_dimension_numbers<[1], [0], [0], [1], [0, 0, 1, 1], [], []>} : vector<128x128xf32>, vector<128x128xf32>, vector<128x128xf32> -> vector<128x128xf32>
    %c0_27 = arith.constant 0 : index
    %c0_28 = arith.constant 0 : index
    %c0_29 = arith.constant 0 : index
    %54 = vector.load %arg3[%c0_27, %c0_28, %c0_29] : memref<2x128x128xf32, #tpu.memory_space<vmem>>, vector<1x128x128xf32>
    %55 = vector.shape_cast %54 : vector<1x128x128xf32> to vector<128x128xf32>
    %cst_30 = arith.constant dense<0.000000e+00> : vector<128x128xf32>
    %56 = tpu.matmul %53, %55, %cst_30 {dimension_numbers = #tpu.dot_dimension_numbers<[1], [0], [0], [1], [0, 0, 1, 1], [], []>} : vector<128x128xf32>, vector<128x128xf32>, vector<128x128xf32> -> vector<128x128xf32>
    %c1_31 = arith.constant 1 : index
    %c0_32 = arith.constant 0 : index
    %c0_33 = arith.constant 0 : index
    %57 = vector.load %arg5[%c1_31, %c0_32, %c0_33] : memref<3x8x128xf32, #tpu.memory_space<vmem>>, vector<1x1x128xf32>
    %58 = vector.shape_cast %57 : vector<1x1x128xf32> to vector<1x128xf32>
    %59 = vector.broadcast %58 : vector<1x128xf32> to vector<128x128xf32>
    %60 = arith.addf %56, %59 : vector<128x128xf32>
    %cst_34 = arith.constant 0.000000e+00 : f32
    %61 = vector.broadcast %cst_34 : f32 to vector<128x128xf32>
    %62 = arith.maximumf %60, %61 : vector<128x128xf32>
    %c1_35 = arith.constant 1 : index
    %c0_36 = arith.constant 0 : index
    %c0_37 = arith.constant 0 : index
    %63 = vector.load %arg4[%c1_35, %c0_36, %c0_37] : memref<3x128x128xf32, #tpu.memory_space<vmem>>, vector<1x128x128xf32>
    %64 = vector.shape_cast %63 : vector<1x128x128xf32> to vector<128x128xf32>
    %cst_38 = arith.constant dense<0.000000e+00> : vector<128x128xf32>
    %65 = tpu.matmul %62, %64, %cst_38 {dimension_numbers = #tpu.dot_dimension_numbers<[1], [0], [0], [1], [0, 0, 1, 1], [], []>} : vector<128x128xf32>, vector<128x128xf32>, vector<128x128xf32> -> vector<128x128xf32>
    %c1_39 = arith.constant 1 : index
    %c1_40 = arith.constant 1 : index
    %c0_41 = arith.constant 0 : index
    %66 = vector.load %arg5[%c1_39, %c1_40, %c0_41] : memref<3x8x128xf32, #tpu.memory_space<vmem>>, vector<1x1x128xf32>
    %67 = vector.shape_cast %66 : vector<1x1x128xf32> to vector<1x128xf32>
    %68 = vector.broadcast %67 : vector<1x128xf32> to vector<128x128xf32>
    %69 = arith.addf %65, %68 : vector<128x128xf32>
    %70 = vector.broadcast %6 : vector<128x1xf32> to vector<128x128xf32>
    %71 = arith.mulf %69, %70 : vector<128x128xf32>
    %cst_42 = arith.constant dense<0.000000e+00> : vector<128xf32>
    %72 = vector.multi_reduction <add>, %71, %cst_42 [0] : vector<128x128xf32> to vector<128xf32>
    %73 = vector.shape_cast %72 : vector<128xf32> to vector<1x128xf32>
    %cst_43 = arith.constant 6.250000e-02 : f32
    %74 = vector.broadcast %cst_43 : f32 to vector<1x128xf32>
    %75 = arith.mulf %73, %74 : vector<1x128xf32>
    %76 = arith.mulf %71, %69 : vector<128x128xf32>
    %cst_44 = arith.constant dense<0.000000e+00> : vector<128xf32>
    %77 = vector.multi_reduction <add>, %76, %cst_44 [0] : vector<128x128xf32> to vector<128xf32>
    %78 = vector.shape_cast %77 : vector<128xf32> to vector<1x128xf32>
    %cst_45 = arith.constant 6.250000e-02 : f32
    %79 = vector.broadcast %cst_45 : f32 to vector<1x128xf32>
    %80 = arith.mulf %78, %79 : vector<1x128xf32>
    %81 = arith.mulf %75, %75 : vector<1x128xf32>
    %82 = arith.subf %80, %81 : vector<1x128xf32>
    %83 = vector.broadcast %75 : vector<1x128xf32> to vector<128x128xf32>
    %84 = arith.subf %69, %83 : vector<128x128xf32>
    %cst_46 = arith.constant 9.99999974E-6 : f32
    %85 = vector.broadcast %cst_46 : f32 to vector<1x128xf32>
    %86 = arith.addf %82, %85 : vector<1x128xf32>
    %87 = math.rsqrt %86 : vector<1x128xf32>
    %88 = vector.broadcast %87 : vector<1x128xf32> to vector<128x128xf32>
    %89 = arith.mulf %84, %88 : vector<128x128xf32>
    %c1_47 = arith.constant 1 : index
    %c2_48 = arith.constant 2 : index
    %c0_49 = arith.constant 0 : index
    %90 = vector.load %arg5[%c1_47, %c2_48, %c0_49] : memref<3x8x128xf32, #tpu.memory_space<vmem>>, vector<1x1x128xf32>
    %91 = vector.shape_cast %90 : vector<1x1x128xf32> to vector<1x128xf32>
    %92 = vector.broadcast %91 : vector<1x128xf32> to vector<128x128xf32>
    %93 = arith.mulf %89, %92 : vector<128x128xf32>
    %c1_50 = arith.constant 1 : index
    %c3_51 = arith.constant 3 : index
    %c0_52 = arith.constant 0 : index
    %94 = vector.load %arg5[%c1_50, %c3_51, %c0_52] : memref<3x8x128xf32, #tpu.memory_space<vmem>>, vector<1x1x128xf32>
    %95 = vector.shape_cast %94 : vector<1x1x128xf32> to vector<1x128xf32>
    %96 = vector.broadcast %95 : vector<1x128xf32> to vector<128x128xf32>
    %97 = arith.addf %93, %96 : vector<128x128xf32>
    %cst_53 = arith.constant 0.000000e+00 : f32
    %98 = vector.broadcast %cst_53 : f32 to vector<128x128xf32>
    %99 = arith.maximumf %97, %98 : vector<128x128xf32>
    %cst_54 = arith.constant dense<0.000000e+00> : vector<128x128xf32>
    %100 = tpu.matmul %0, %99, %cst_54 {dimension_numbers = #tpu.dot_dimension_numbers<[1], [0], [0], [1], [0, 0, 1, 1], [], []>} : vector<128x128xf32>, vector<128x128xf32>, vector<128x128xf32> -> vector<128x128xf32>
    %c1_55 = arith.constant 1 : index
    %c0_56 = arith.constant 0 : index
    %c0_57 = arith.constant 0 : index
    %101 = vector.load %arg3[%c1_55, %c0_56, %c0_57] : memref<2x128x128xf32, #tpu.memory_space<vmem>>, vector<1x128x128xf32>
    %102 = vector.shape_cast %101 : vector<1x128x128xf32> to vector<128x128xf32>
    %cst_58 = arith.constant dense<0.000000e+00> : vector<128x128xf32>
    %103 = tpu.matmul %100, %102, %cst_58 {dimension_numbers = #tpu.dot_dimension_numbers<[1], [0], [0], [1], [0, 0, 1, 1], [], []>} : vector<128x128xf32>, vector<128x128xf32>, vector<128x128xf32> -> vector<128x128xf32>
    %c2_59 = arith.constant 2 : index
    %c0_60 = arith.constant 0 : index
    %c0_61 = arith.constant 0 : index
    %104 = vector.load %arg5[%c2_59, %c0_60, %c0_61] : memref<3x8x128xf32, #tpu.memory_space<vmem>>, vector<1x1x128xf32>
    %105 = vector.shape_cast %104 : vector<1x1x128xf32> to vector<1x128xf32>
    %106 = vector.broadcast %105 : vector<1x128xf32> to vector<128x128xf32>
    %107 = arith.addf %103, %106 : vector<128x128xf32>
    %cst_62 = arith.constant 0.000000e+00 : f32
    %108 = vector.broadcast %cst_62 : f32 to vector<128x128xf32>
    %109 = arith.maximumf %107, %108 : vector<128x128xf32>
    %c2_63 = arith.constant 2 : index
    %c0_64 = arith.constant 0 : index
    %c0_65 = arith.constant 0 : index
    %110 = vector.load %arg4[%c2_63, %c0_64, %c0_65] : memref<3x128x128xf32, #tpu.memory_space<vmem>>, vector<1x128x128xf32>
    %111 = vector.shape_cast %110 : vector<1x128x128xf32> to vector<128x128xf32>
    %cst_66 = arith.constant dense<0.000000e+00> : vector<128x128xf32>
    %112 = tpu.matmul %109, %111, %cst_66 {dimension_numbers = #tpu.dot_dimension_numbers<[1], [0], [0], [1], [0, 0, 1, 1], [], []>} : vector<128x128xf32>, vector<128x128xf32>, vector<128x128xf32> -> vector<128x128xf32>
    %c2_67 = arith.constant 2 : index
    %c1_68 = arith.constant 1 : index
    %c0_69 = arith.constant 0 : index
    %113 = vector.load %arg5[%c2_67, %c1_68, %c0_69] : memref<3x8x128xf32, #tpu.memory_space<vmem>>, vector<1x1x128xf32>
    %114 = vector.shape_cast %113 : vector<1x1x128xf32> to vector<1x128xf32>
    %115 = vector.broadcast %114 : vector<1x128xf32> to vector<128x128xf32>
    %116 = arith.addf %112, %115 : vector<128x128xf32>
    %117 = vector.broadcast %6 : vector<128x1xf32> to vector<128x128xf32>
    %118 = arith.mulf %116, %117 : vector<128x128xf32>
    %cst_70 = arith.constant dense<0.000000e+00> : vector<128xf32>
    %119 = vector.multi_reduction <add>, %118, %cst_70 [0] : vector<128x128xf32> to vector<128xf32>
    %120 = vector.shape_cast %119 : vector<128xf32> to vector<1x128xf32>
    %cst_71 = arith.constant 6.250000e-02 : f32
    %121 = vector.broadcast %cst_71 : f32 to vector<1x128xf32>
    %122 = arith.mulf %120, %121 : vector<1x128xf32>
    %123 = arith.mulf %118, %116 : vector<128x128xf32>
    %cst_72 = arith.constant dense<0.000000e+00> : vector<128xf32>
    %124 = vector.multi_reduction <add>, %123, %cst_72 [0] : vector<128x128xf32> to vector<128xf32>
    %125 = vector.shape_cast %124 : vector<128xf32> to vector<1x128xf32>
    %cst_73 = arith.constant 6.250000e-02 : f32
    %126 = vector.broadcast %cst_73 : f32 to vector<1x128xf32>
    %127 = arith.mulf %125, %126 : vector<1x128xf32>
    %128 = arith.mulf %122, %122 : vector<1x128xf32>
    %129 = arith.subf %127, %128 : vector<1x128xf32>
    %130 = vector.broadcast %122 : vector<1x128xf32> to vector<128x128xf32>
    %131 = arith.subf %116, %130 : vector<128x128xf32>
    %cst_74 = arith.constant 9.99999974E-6 : f32
    %132 = vector.broadcast %cst_74 : f32 to vector<1x128xf32>
    %133 = arith.addf %129, %132 : vector<1x128xf32>
    %134 = math.rsqrt %133 : vector<1x128xf32>
    %135 = vector.broadcast %134 : vector<1x128xf32> to vector<128x128xf32>
    %136 = arith.mulf %131, %135 : vector<128x128xf32>
    %c2_75 = arith.constant 2 : index
    %c2_76 = arith.constant 2 : index
    %c0_77 = arith.constant 0 : index
    %137 = vector.load %arg5[%c2_75, %c2_76, %c0_77] : memref<3x8x128xf32, #tpu.memory_space<vmem>>, vector<1x1x128xf32>
    %138 = vector.shape_cast %137 : vector<1x1x128xf32> to vector<1x128xf32>
    %139 = vector.broadcast %138 : vector<1x128xf32> to vector<128x128xf32>
    %140 = arith.mulf %136, %139 : vector<128x128xf32>
    %c2_78 = arith.constant 2 : index
    %c3_79 = arith.constant 3 : index
    %c0_80 = arith.constant 0 : index
    %141 = vector.load %arg5[%c2_78, %c3_79, %c0_80] : memref<3x8x128xf32, #tpu.memory_space<vmem>>, vector<1x1x128xf32>
    %142 = vector.shape_cast %141 : vector<1x1x128xf32> to vector<1x128xf32>
    %143 = vector.broadcast %142 : vector<1x128xf32> to vector<128x128xf32>
    %144 = arith.addf %140, %143 : vector<128x128xf32>
    %c0_81 = arith.constant 0 : index
    %c0_82 = arith.constant 0 : index
    %145 = vector.load %arg8[%c0_81, %c0_82] : memref<128x128xf32, #tpu.memory_space<vmem>>, vector<128x128xf32>
    tpu.vector_store %arg8[%c0_81, %c0_82], %144 {strides = array<i32>} : memref<128x128xf32, #tpu.memory_space<vmem>>, vector<128x128xf32>,
    %c0_83 = arith.constant 0 : index
    %c0_84 = arith.constant 0 : index
    %146 = vector.load %arg6[%c0_83, %c0_84] : memref<8x128xf32, #tpu.memory_space<vmem>>, vector<8x128xf32>
    %cst_85 = arith.constant dense<0.000000e+00> : vector<8x128xf32>
    %147 = tpu.matmul %146, %144, %cst_85 {dimension_numbers = #tpu.dot_dimension_numbers<[1], [0], [0], [1], [0, 0, 1, 1], [], []>} : vector<8x128xf32>, vector<128x128xf32>, vector<8x128xf32> -> vector<8x128xf32>
    %c0_86 = arith.constant 0 : index
    %c0_87 = arith.constant 0 : index
    %148 = vector.load %arg7[%c0_86, %c0_87] : memref<8x128xf32, #tpu.memory_space<vmem>>, vector<8x128xf32>
    tpu.vector_store %arg7[%c0_86, %c0_87], %147 {strides = array<i32>} : memref<8x128xf32, #tpu.memory_space<vmem>>, vector<8x128xf32>,
    return
  }
}

</mosaic_0001>

<bundles_post_ra>
// kernel: tu_encoder_forward.1
= control target key start
LH: loop header
LB: loop body
LE: loop exit
PB: predicated region body
PF: predicated region fallthrough
CT: control target
= control target key end

     0   :  { %14 = vsyncpa [#allocation3], 0  ;;  %s3490_s27 = smov [#allocation2]   ;;  %s4450_s0 = inlined_call_operand.hbm [shape: f32[128,128], index: 0, kind: input, shape index: {}]   ;;  %s4451_s1 = inlined_call_operand.vmem [shape: f32[128,128], index: 1, kind: input, shape index: {}]   ;;  %s4452_s2 = inlined_call_operand.vmem [shape: f32[128,128], index: 2, kind: input, shape index: {}]   ;;  %s4453_s3 = inlined_call_operand.vmem [shape: f32[2,128,128], index: 3, kind: input, shape index: {}]   ;;  %s4454_s4 = inlined_call_operand.vmem [shape: f32[3,128,128], index: 4, kind: input, shape index: {}]   ;;  %s4455_s5 = inlined_call_operand.vmem [shape: f32[3,8,128], index: 5, kind: input, shape index: {}]   ;;  %s4456_s6 = inlined_call_operand.vmem [shape: f32[8,128], index: 6, kind: input, shape index: {}]   ;;  %s4457_s7 = inlined_call_operand.vmem [shape: f32[8,128], index: 7, kind: output, shape index: {0}]   ;;  %s4458_s8 = inlined_call_operand.vmem [shape: f32[128,128], index: 8, kind: output, shape index: {1}]  }
   0x1   :  { %s20_s28 = sshll.u32 %s3490_s27, 4  ;;  %s3466_s9 = scalar_lea.hbm %s4450_s0, 2048  ;;  %s21_s28 = int_to_ptr.vmem [resolvable:$true] %s20_s28 }
   0x2   :  { %p3467_p0 = scmp.ne.s32.totalorder %s4450_s0, %s3466_s9  ;;  %p3470_p1 = scmp.lt.u32.totalorder %s3466_s9, %s4450_s0 }
   0x4   :  { %p3472_p2 = pnand %p3470_p1, %p3467_p0 }
   0x6   :  { %3475 = shalt.err (!%p3472_p2)
}
   0x7   :  { %s3476_s14 = scalar_lea.vmem %s21_s28, 2048  ;;  %p3481_p4 = scmp.lt.s32.totalorder %s21_s28, %s21_s28 }
   0x8   :  { %p3477_p3 = scmp.ne.s32.totalorder %s21_s28, %s3476_s14  ;;  %p3482_p5 = scmp.lt.s32.totalorder %s3476_s14, %s3476_s14 }
   0xa   :  { %p3483_p6 = por %p3482_p5, %p3481_p4 }
   0xc   :  { %p3484_p7 = pnand %p3483_p6, %p3477_p3 }
   0xe   :  { %3487 = shalt.err (!%p3484_p7)
}
   0xf   :  { %s3491_s15 = smov 128   ;;  %s3492_s16 = smov 8  }
  0x10   :  { %26 = dma.hbm_to_vmem [thread:$0]  %s4450_s0, 2048, %s21_s28, [#allocation3], %s3491_s15, %s3491_s15, %s3492_s16  }
  0x11   :  { %3488 = dma.done.wait [#allocation3], 2048  }
  0x12   :  { %3489 = vsyncadd [#allocation3], 4294965248  ;;  %v58_v0 = vld [vmem:[%s4451_s1] sm:$0xff]  ;;  %v59_v1 = vld [vmem:[%s4451_s1 + $0x8] sm:$0xff]  ;;  %vm3494_vm0 = vmmov 0  }
  0x13   :  { %v60_v2 = vld [vmem:[%s4451_s1 + $0x10] sm:$0xff]  ;;  %v3126_v3 = vpack.c.bf16 %v59_v1, %v58_v0  ;;  %v61_v4 = vld [vmem:[%s4451_s1 + $0x18] sm:$0xff]  ;;  %v62_v6 = vld [vmem:[%s4451_s1 + $0x20] sm:$0xff] }
  0x14   :  { %v3130_v5 = vpack.c.bf16 %v61_v4, %v60_v2  ;;  %v63_v7 = vld [vmem:[%s4451_s1 + $0x28] sm:$0xff]  ;;  %v3571_v9 = vld [vmem:[#allocation2] sm:$0xff]  ;;  %v64_v10 = vld [vmem:[%s4451_s1 + $0x30] sm:$0xff] }
  0x15   :  { %3127 = vmatprep.subr.bf16.mxu0 %v3126_v3  ;;  %v3134_v8 = vpack.c.bf16 %v63_v7, %v62_v6  ;;  %v65_v11 = vld [vmem:[%s4451_s1 + $0x38] sm:$0xff]  ;;  %2619 = vmatprep.mubr.f32.mxu0 %v3571_v9  ;;  %v66_v13 = vld [vmem:[%s4451_s1 + $0x40] sm:$0xff]  ;;  %v67_v14 = vld [vmem:[%s4451_s1 + $0x48] sm:$0xff] }
  0x16   :  { %3129 = vmatpush3.bf16.msra.mxu0 %v3126_v3  ;;  %v3138_v12 = vpack.c.bf16 %v65_v11, %v64_v10  ;;  %v284_v15 = vld [vmem:[%s4452_s2] sm:$0xff]  ;;  %v285_v16 = vld [vmem:[%s4452_s2 + $0x8] sm:$0xff]  ;;  %v286_v17 = vld [vmem:[%s4452_s2 + $0x10] sm:$0xff]  ;;  %v3142_v21 = vpack.c.bf16 %v67_v14, %v66_v13 }
  0x17   :  { %3131 = vmatprep.subr.bf16.mxu0 %v3130_v5  ;;  %v287_v18 = vld [vmem:[%s4452_s2 + $0x18] sm:$0xff]  ;;  %v3158_v19 = vpack.c.bf16 %v285_v16, %v284_v15  ;;  %v288_v22 = vld [vmem:[%s4452_s2 + $0x20] sm:$0xff]  ;;  %v289_v23 = vld [vmem:[%s4452_s2 + $0x28] sm:$0xff] }
  0x18   :  { %v3162_v20 = vpack.c.bf16 %v287_v18, %v286_v17  ;;  %v68_v24 = vld [vmem:[%s4451_s1 + $0x50] sm:$0xff]  ;;  %v69_v25 = vld [vmem:[%s4451_s1 + $0x58] sm:$0xff]  ;;  %v3166_v26 = vpack.c.bf16 %v289_v23, %v288_v22  ;;  %v70_v30 = vld [vmem:[%s4451_s1 + $0x60] sm:$0xff] }
  0x19   :  { %3159 = vmatprep.subr.bf16.mxu1 %v3158_v19  ;;  %v3146_v27 = vpack.c.bf16 %v69_v25, %v68_v24  ;;  %v290_v28 = vld [vmem:[%s4452_s2 + $0x30] sm:$0xff]  ;;  %v291_v29 = vld [vmem:[%s4452_s2 + $0x38] sm:$0xff]  ;;  %v71_v31 = vld [vmem:[%s4451_s1 + $0x68] sm:$0xff] }
  0x1a   :  { %3133 = vmatpush3.bf16.msra.mxu0 %v3130_v5  ;;  %3161 = vmatpush3.bf16.msra.mxu1 %v3158_v19  ;;  %v3170_v32 = vpack.c.bf16 %v291_v29, %v290_v28  ;;  %v3150_v33 = vpack.c.bf16 %v71_v31, %v70_v30  ;;  %v292_v34 = vld [vmem:[%s4452_s2 + $0x40] sm:$0xff]  ;;  %v293_v35 = vld [vmem:[%s4452_s2 + $0x48] sm:$0xff]  ;;  %v72_v36 = vld [vmem:[%s4451_s1 + $0x70] sm:$0xff] }
  0x1b   :  { %3135 = vmatprep.subr.bf16.mxu0 %v3134_v8  ;;  %3163 = vmatprep.subr.bf16.mxu1 %v3162_v20  ;;  %v73_v37 = vld [vmem:[%s4451_s1 + $0x78] sm:$0xff]  ;;  %v3174_v38 = vpack.c.bf16 %v293_v35, %v292_v34  ;;  %v294_v40 = vld [vmem:[%s4452_s2 + $0x50] sm:$0xff]  ;;  %v296_v43 = vld [vmem:[%s4452_s2 + $0x60] sm:$0xff] }
  0x1c   :  { %v3154_v39 = vpack.c.bf16 %v73_v37, %v72_v36  ;;  %v295_v41 = vld [vmem:[%s4452_s2 + $0x58] sm:$0xff]  ;;  %v297_v44 = vld [vmem:[%s4452_s2 + $0x68] sm:$0xff]  ;;  %v3648_v47 = vld [vmem:[#allocation2 + $0x10] sm:$0xff] }
  0x1d   :  { %v3178_v42 = vpack.c.bf16 %v295_v41, %v294_v40  ;;  %v3646_v45 = vld [vmem:[#allocation2 + $0x8] sm:$0xff]  ;;  %v3182_v46 = vpack.c.bf16 %v297_v44, %v296_v43  ;;  %v298_v48 = vld [vmem:[%s4452_s2 + $0x70] sm:$0xff]  ;;  %v299_v49 = vld [vmem:[%s4452_s2 + $0x78] sm:$0xff] }
  0x1e   :  { %3137 = vmatpush3.bf16.msra.mxu0 %v3134_v8  ;;  %3165 = vmatpush3.bf16.msra.mxu1 %v3162_v20  ;;  %v3658_v50 = vld [vmem:[#allocation2 + $0x18] sm:$0xff]  ;;  %v3186_v51 = vpack.c.bf16 %v299_v49, %v298_v48  ;;  %v3660_v52 = vld [vmem:[#allocation2 + $0x20] sm:$0xff]  ;;  %v3664_v53 = vld [vmem:[#allocation2 + $0x28] sm:$0xff] }
  0x1f   :  { %3139 = vmatprep.subr.bf16.mxu0 %v3138_v12  ;;  %3167 = vmatprep.subr.bf16.mxu1 %v3166_v26  ;;  %v3666_v54 = vld [vmem:[#allocation2 + $0x30] sm:$0xff]  ;;  %v3670_v55 = vld [vmem:[#allocation2 + $0x38] sm:$0xff]  ;;  %v3672_v56 = vld [vmem:[#allocation2 + $0x40] sm:$0xff] }
  0x20   :  { %v3676_v57 = vld [vmem:[#allocation2 + $0x48] sm:$0xff]  ;;  %v3678_v58 = vld [vmem:[#allocation2 + $0x50] sm:$0xff]  ;;  %v3682_v59 = vld [vmem:[#allocation2 + $0x58] sm:$0xff] }
  0x21   :  { %v3684_v60 = vld [vmem:[#allocation2 + $0x60] sm:$0xff]  ;;  %v3688_v61 = vld [vmem:[#allocation2 + $0x68] sm:$0xff]  ;;  %v3690_v62 = vld [vmem:[#allocation2 + $0x70] sm:$0xff] }
  0x22   :  { %3141 = vmatpush3.bf16.msra.mxu0 %v3138_v12  ;;  %3169 = vmatpush3.bf16.msra.mxu1 %v3166_v26  ;;  %v3694_v63 = vld [vmem:[#allocation2 + $0x78] sm:$0xff]  ;;  %v466_v0 = vld [vmem:[%s4454_s4] sm:$0xff]  ;;  %v467_v1 = vld [vmem:[%s4454_s4 + $0x8] sm:$0xff] }
  0x23   :  { %3143 = vmatprep.subr.bf16.mxu0 %v3142_v21  ;;  %3171 = vmatprep.subr.bf16.mxu1 %v3170_v32  ;;  %v468_v2 = vld [vmem:[%s4454_s4 + $0x10] sm:$0xff]  ;;  %v3190_v3 = vpack.c.bf16 %v467_v1, %v466_v0  ;;  %v469_v4 = vld [vmem:[%s4454_s4 + $0x18] sm:$0xff]  ;;  %v470_v6 = vld [vmem:[%s4454_s4 + $0x20] sm:$0xff] }
  0x24   :  { %v3194_v5 = vpack.c.bf16 %v469_v4, %v468_v2  ;;  %v471_v7 = vld [vmem:[%s4454_s4 + $0x28] sm:$0xff]  ;;  %v472_v10 = vld [vmem:[%s4454_s4 + $0x30] sm:$0xff]  ;;  %v473_v11 = vld [vmem:[%s4454_s4 + $0x38] sm:$0xff] }
  0x25   :  { %v3198_v8 = vpack.c.bf16 %v471_v7, %v470_v6  ;;  %v3202_v12 = vpack.c.bf16 %v473_v11, %v472_v10  ;;  %v474_v13 = vld [vmem:[%s4454_s4 + $0x40] sm:$0xff]  ;;  %v475_v14 = vld [vmem:[%s4454_s4 + $0x48] sm:$0xff]  ;;  %v476_v16 = vld [vmem:[%s4454_s4 + $0x50] sm:$0xff] }
  0x26   :  { %3145 = vmatpush3.bf16.msra.mxu0 %v3142_v21  ;;  %3173 = vmatpush3.bf16.msra.mxu1 %v3170_v32  ;;  %v3206_v15 = vpack.c.bf16 %v475_v14, %v474_v13  ;;  %v477_v17 = vld [vmem:[%s4454_s4 + $0x58] sm:$0xff]  ;;  %v478_v19 = vld [vmem:[%s4454_s4 + $0x60] sm:$0xff]  ;;  %v479_v20 = vld [vmem:[%s4454_s4 + $0x68] sm:$0xff] }
  0x27   :  { %3147 = vmatprep.subr.bf16.mxu0 %v3146_v27  ;;  %3175 = vmatprep.subr.bf16.mxu1 %v3174_v38  ;;  %v3210_v18 = vpack.c.bf16 %v477_v17, %v476_v16  ;;  %v3214_v21 = vpack.c.bf16 %v479_v20, %v478_v19  ;;  %v2214_v41 = vld [vmem:[%s4455_s5] ss:$0 sm:$0xff] }
  0x2a   :  { %3149 = vmatpush3.bf16.msra.mxu0 %v3146_v27  ;;  %3177 = vmatpush3.bf16.msra.mxu1 %v3174_v38  ;;  %v480_v38 = vld [vmem:[%s4454_s4 + $0x70] sm:$0xff] }
  0x2b   :  { %3151 = vmatprep.subr.bf16.mxu0 %v3150_v33  ;;  %3179 = vmatprep.subr.bf16.mxu1 %v3178_v42 }
  0x2e   :  { %3153 = vmatpush3.bf16.msra.mxu0 %v3150_v33  ;;  %3181 = vmatpush3.bf16.msra.mxu1 %v3178_v42 }
  0x2f   :  { %3155 = vmatprep.subr.bf16.mxu0 %v3154_v39  ;;  %3183 = vmatprep.subr.bf16.mxu1 %v3182_v46 }
  0x32   :  { %3157 = vmatpush3.bf16.msra.mxu0 %v3154_v39  ;;  %3185 = vmatpush3.bf16.msra.mxu1 %v3182_v46  ;;  %v481_v39 = vld [vmem:[%s4454_s4 + $0x78] sm:$0xff] }
  0x33   :  { %3187 = vmatprep.subr.bf16.mxu1 %v3186_v51  ;;  %3191 = vmatprep.subr.bf16.mxu0 %v3190_v3  ;;  %v3218_v40 = vpack.c.bf16 %v481_v39, %v480_v38 }
  0x35   :  { %2620 = vmatmul.mubr.f32.vlgmr.msra.gmra.mrb[0].mxu0 %v3646_v45 }
  0x36   :  { %2622 = vmatprep.mubr.f32.mxu0 %v3648_v47  ;;  %3189 = vmatpush3.bf16.msra.mxu1 %v3186_v51 }
  0x37   :  { %3193 = vmatpush3.bf16.msra.mxu0 %v3190_v3 }
  0x38   :  { %3195 = vmatprep.subr.bf16.mxu0 %v3194_v5 }
  0x39   :  { %2623 = vmatmul.mubr.f32.gmra.mrb[2].mxu0 %v3658_v50 }
  0x3a   :  { %2625 = vmatprep.mubr.f32.mxu0 %v3660_v52 }
  0x3b   :  { %3197 = vmatpush3.bf16.msra.mxu0 %v3194_v5 }
  0x3c   :  { %3199 = vmatprep.subr.bf16.mxu0 %v3198_v8 }
  0x3d   :  { %2626 = vmatmul.mubr.f32.gmra.mrb[4].mxu0 %v3664_v53 }
  0x3e   :  { %2628 = vmatprep.mubr.f32.mxu0 %v3666_v54 }
  0x3f   :  { %3201 = vmatpush3.bf16.msra.mxu0 %v3198_v8 }
  0x40   :  { %3203 = vmatprep.subr.bf16.mxu0 %v3202_v12 }
  0x41   :  { %2629 = vmatmul.mubr.f32.gmra.mrb[6].mxu0 %v3670_v55 }
  0x42   :  { %2631 = vmatprep.mubr.f32.mxu0 %v3672_v56 }
  0x43   :  { %3205 = vmatpush3.bf16.msra.mxu0 %v3202_v12 }
  0x44   :  { %3207 = vmatprep.subr.bf16.mxu0 %v3206_v15 }
  0x45   :  { %2632 = vmatmul.mubr.f32.gmra.mrb[8].mxu0 %v3676_v57 }
  0x46   :  { %2634 = vmatprep.mubr.f32.mxu0 %v3678_v58 }
  0x47   :  { %3209 = vmatpush3.bf16.msra.mxu0 %v3206_v15 }
  0x48   :  { %3211 = vmatprep.subr.bf16.mxu0 %v3210_v18 }
  0x49   :  { %2635 = vmatmul.mubr.f32.gmra.mrb[10].mxu0 %v3682_v59 }
  0x4a   :  { %2637 = vmatprep.mubr.f32.mxu0 %v3684_v60 }
  0x4b   :  { %3213 = vmatpush3.bf16.msra.mxu0 %v3210_v18 }
  0x4c   :  { %3215 = vmatprep.subr.bf16.mxu0 %v3214_v21 }
  0x4d   :  { %2638 = vmatmul.mubr.f32.gmra.mrb[12].mxu0 %v3688_v61 }
  0x4e   :  { %2640 = vmatprep.mubr.f32.mxu0 %v3690_v62 }
  0x4f   :  { %3217 = vmatpush3.bf16.msra.mxu0 %v3214_v21 }
  0x50   :  { %3219 = vmatprep.subr.bf16.mxu0 %v3218_v40 }
  0x51   :  { %2641 = vmatmul.mubr.f32.gmra.mrb[14].mxu0 %v3694_v63 }
  0x53   :  { %3221 = vmatpush3.bf16.msra.mxu0 %v3218_v40 }
 0x108   :  { %v2621_v22 = vpop.f32.mrb[0].mxu0 }
 0x109   :  { %v205_v23 = vpop.f32.mrb[1].mxu0 }
 0x10a   :  { %2675 = vmatprep.mubr.f32.mxu1 %v205_v23 }
 0x10b   :  { %2676 = vmatmul.mubr.f32.vlgmr.msra.gmra.mrb[0].mxu1 %v2621_v22 }
 0x10c   :  { %v2624_v24 = vpop.f32.mrb[2].mxu0 }
 0x10d   :  { %v215_v25 = vpop.f32.mrb[3].mxu0 }
 0x10e   :  { %2678 = vmatprep.mubr.f32.mxu1 %v215_v25 }
 0x10f   :  { %2679 = vmatmul.mubr.f32.gmra.mrb[2].mxu1 %v2624_v24 }
 0x110   :  { %v2627_v26 = vpop.f32.mrb[4].mxu0 }
 0x111   :  { %v225_v27 = vpop.f32.mrb[5].mxu0 }
 0x112   :  { %2681 = vmatprep.mubr.f32.mxu1 %v225_v27 }
 0x113   :  { %2682 = vmatmul.mubr.f32.gmra.mrb[4].mxu1 %v2627_v26 }
 0x114   :  { %v2630_v28 = vpop.f32.mrb[6].mxu0 }
 0x115   :  { %v235_v29 = vpop.f32.mrb[7].mxu0 }
 0x116   :  { %2684 = vmatprep.mubr.f32.mxu1 %v235_v29 }
 0x117   :  { %2685 = vmatmul.mubr.f32.gmra.mrb[6].mxu1 %v2630_v28 }
 0x118   :  { %v2633_v30 = vpop.f32.mrb[8].mxu0 }
 0x119   :  { %v245_v31 = vpop.f32.mrb[9].mxu0 }
 0x11a   :  { %2687 = vmatprep.mubr.f32.mxu1 %v245_v31 }
 0x11b   :  { %2688 = vmatmul.mubr.f32.gmra.mrb[8].mxu1 %v2633_v30 }
 0x11c   :  { %v2636_v32 = vpop.f32.mrb[10].mxu0 }
 0x11d   :  { %v255_v33 = vpop.f32.mrb[11].mxu0 }
 0x11e   :  { %2690 = vmatprep.mubr.f32.mxu1 %v255_v33 }
 0x11f   :  { %2691 = vmatmul.mubr.f32.gmra.mrb[10].mxu1 %v2636_v32 }
 0x120   :  { %v2639_v34 = vpop.f32.mrb[12].mxu0 }
 0x121   :  { %v265_v35 = vpop.f32.mrb[13].mxu0 }
 0x122   :  { %2693 = vmatprep.mubr.f32.mxu1 %v265_v35 }
 0x123   :  { %2694 = vmatmul.mubr.f32.gmra.mrb[12].mxu1 %v2639_v34 }
 0x124   :  { %v2642_v36 = vpop.f32.mrb[14].mxu0 }
 0x125   :  { %v275_v37 = vpop.f32.mrb[15].mxu0 }
 0x126   :  { %2696 = vmatprep.mubr.f32.mxu1 %v275_v37 }
 0x127   :  { %2697 = vmatmul.mubr.f32.gmra.mrb[14].mxu1 %v2642_v36 }
 0x128   :  { %2787 = vmatprep.mubr.f32.mxu1 %v3571_v9 }
 0x1de   :  { %v2677_v42 = vpop.f32.mrb[0].mxu1 }
 0x1df   :  { %v377_v43 = vadd.f32 %v2677_v42, %v2214_v41  ;;  %v371_v44 = vpop.f32.mrb[1].mxu1  ;;  %v3752_v42 = vld [vmem:[%s4455_s5 + $0x1] ss:$0 sm:$0xff] }
 0x1e0   :  { %v372_v46 = vadd.f32 %v2214_v41, %v371_v44 }
 0x1e1   :  { %v451_v49 = vmax.f32 %v377_v43, 0.0 }
 0x1e2   :  { %v450_v9 = vmax.f32 %v372_v46, 0.0  ;;  %v2680_v48 = vpop.f32.mrb[2].mxu1 }
 0x1e3   :  { %v387_v51 = vadd.f32 %v2680_v48, %v2214_v41  ;;  %v381_v0 = vpop.f32.mrb[3].mxu1 }
 0x1e4   :  { %v382_v1 = vadd.f32 %v2214_v41, %v381_v0  ;;  %2731 = vmatprep.mubr.f32.mxu0 %v450_v9 }
 0x1e5   :  { %2732 = vmatmul.mubr.f32.vlgmr.msra.gmra.mrb[16].mxu0 %v451_v49  ;;  %v453_v4 = vmax.f32 %v387_v51, 0.0 }
 0x1e6   :  { %v452_v2 = vmax.f32 %v382_v1, 0.0  ;;  %v2683_v3 = vpop.f32.mrb[4].mxu1 }
 0x1e7   :  { %v397_v5 = vadd.f32 %v2683_v3, %v2214_v41  ;;  %v391_v6 = vpop.f32.mrb[5].mxu1 }
 0x1e8   :  { %v392_v7 = vadd.f32 %v2214_v41, %v391_v6  ;;  %2734 = vmatprep.mubr.f32.mxu0 %v452_v2 }
 0x1e9   :  { %2735 = vmatmul.mubr.f32.gmra.mrb[18].mxu0 %v453_v4  ;;  %v455_v11 = vmax.f32 %v397_v5, 0.0 }
 0x1ea   :  { %v454_v8 = vmax.f32 %v392_v7, 0.0  ;;  %v2686_v10 = vpop.f32.mrb[6].mxu1 }
 0x1eb   :  { %v407_v12 = vadd.f32 %v2686_v10, %v2214_v41  ;;  %v401_v13 = vpop.f32.mrb[7].mxu1 }
 0x1ec   :  { %v402_v14 = vadd.f32 %v2214_v41, %v401_v13  ;;  %2737 = vmatprep.mubr.f32.mxu0 %v454_v8 }
 0x1ed   :  { %2738 = vmatmul.mubr.f32.gmra.mrb[20].mxu0 %v455_v11  ;;  %v457_v17 = vmax.f32 %v407_v12, 0.0 }
 0x1ee   :  { %v456_v15 = vmax.f32 %v402_v14, 0.0  ;;  %v2689_v16 = vpop.f32.mrb[8].mxu1 }
 0x1ef   :  { %v417_v18 = vadd.f32 %v2689_v16, %v2214_v41  ;;  %v411_v19 = vpop.f32.mrb[9].mxu1  ;;  %v948_v16 = vld [vmem:[%s4453_s3 + $0x8] sm:$0xff] }
 0x1f0   :  { %v412_v20 = vadd.f32 %v2214_v41, %v411_v19  ;;  %2740 = vmatprep.mubr.f32.mxu0 %v456_v15  ;;  %v947_v15 = vld [vmem:[%s4453_s3] sm:$0xff] }
 0x1f1   :  { %2741 = vmatmul.mubr.f32.gmra.mrb[22].mxu0 %v457_v17  ;;  %v459_v23 = vmax.f32 %v417_v18, 0.0  ;;  %v949_v17 = vld [vmem:[%s4453_s3 + $0x10] sm:$0xff] }
 0x1f2   :  { %v458_v21 = vmax.f32 %v412_v20, 0.0  ;;  %v2692_v22 = vpop.f32.mrb[10].mxu1 }
 0x1f3   :  { %v427_v24 = vadd.f32 %v2692_v22, %v2214_v41  ;;  %v421_v25 = vpop.f32.mrb[11].mxu1  ;;  %v3254_v22 = vpack.c.bf16 %v948_v16, %v947_v15 }
 0x1f4   :  { %v422_v26 = vadd.f32 %v2214_v41, %v421_v25  ;;  %2743 = vmatprep.mubr.f32.mxu0 %v458_v21  ;;  %v952_v25 = vld [vmem:[%s4453_s3 + $0x28] sm:$0xff] }
 0x1f5   :  { %2744 = vmatmul.mubr.f32.gmra.mrb[24].mxu0 %v459_v23  ;;  %v461_v29 = vmax.f32 %v427_v24, 0.0  ;;  %v950_v23 = vld [vmem:[%s4453_s3 + $0x18] sm:$0xff]  ;;  %v951_v24 = vld [vmem:[%s4453_s3 + $0x20] sm:$0xff]  ;;  %3255 = vmatprep.subr.bf16.mxu0 %v3254_v22 }
 0x1f6   :  { %v460_v27 = vmax.f32 %v422_v26, 0.0  ;;  %v2695_v28 = vpop.f32.mrb[12].mxu1  ;;  %3257 = vmatpush3.bf16.msra.mxu0 %v3254_v22 }
 0x1f7   :  { %v437_v30 = vadd.f32 %v2695_v28, %v2214_v41  ;;  %v431_v31 = vpop.f32.mrb[13].mxu1  ;;  %v3258_v28 = vpack.c.bf16 %v950_v23, %v949_v17 }
 0x1f8   :  { %v432_v32 = vadd.f32 %v2214_v41, %v431_v31  ;;  %2746 = vmatprep.mubr.f32.mxu0 %v460_v27 }
 0x1f9   :  { %2747 = vmatmul.mubr.f32.gmra.mrb[26].mxu0 %v461_v29  ;;  %v463_v35 = vmax.f32 %v437_v30, 0.0  ;;  %3259 = vmatprep.subr.bf16.mxu0 %v3258_v28 }
 0x1fa   :  { %v462_v33 = vmax.f32 %v432_v32, 0.0  ;;  %v2698_v34 = vpop.f32.mrb[14].mxu1  ;;  %3261 = vmatpush3.bf16.msra.mxu0 %v3258_v28 }
 0x1fb   :  { %v447_v36 = vadd.f32 %v2698_v34, %v2214_v41  ;;  %v441_v37 = vpop.f32.mrb[15].mxu1  ;;  %v3262_v34 = vpack.c.bf16 %v952_v25, %v951_v24 }
 0x1fc   :  { %v442_v38 = vadd.f32 %v2214_v41, %v441_v37  ;;  %2749 = vmatprep.mubr.f32.mxu0 %v462_v33 }
 0x1fd   :  { %2750 = vmatmul.mubr.f32.gmra.mrb[28].mxu0 %v463_v35  ;;  %v465_v40 = vmax.f32 %v447_v36, 0.0  ;;  %3263 = vmatprep.subr.bf16.mxu0 %v3262_v34 }
 0x1fe   :  { %v464_v39 = vmax.f32 %v442_v38, 0.0  ;;  %3265 = vmatpush3.bf16.msra.mxu0 %v3262_v34 }
 0x200   :  { %2752 = vmatprep.mubr.f32.mxu0 %v464_v39 }
 0x201   :  { %2753 = vmatmul.mubr.f32.gmra.mrb[30].mxu0 %v465_v40  ;;  %v953_v40 = vld [vmem:[%s4453_s3 + $0x30] sm:$0xff] }
 0x2b8   :  { %v2733_v43 = vpop.f32.mrb[16].mxu0 }
 0x2b9   :  { %v3755_v44 = vadd.f32 %v2733_v43, %v3752_v42  ;;  %v553_v46 = vpop.f32.mrb[17].mxu0  ;;  %v954_v43 = vld [vmem:[%s4453_s3 + $0x38] sm:$0xff] }
 0x2ba   :  { %v3758_v9 = vadd.f32 %v3752_v42, %v553_v46 }
 0x2bb   :  { %v671_v41 = vmul.f32 %v3755_v44, %v3755_v44 }
 0x2bc   :  { %v648_v48 = vadd.f32 %v3755_v44, %v3758_v9  ;;  %v670_v49 = vmul.f32 %v3758_v9, %v3758_v9  ;;  %v2736_v51 = vpop.f32.mrb[18].mxu0 }
 0x2bd   :  { %v3767_v0 = vadd.f32 %v2736_v51, %v3752_v42  ;;  %v563_v1 = vpop.f32.mrb[19].mxu0 }
 0x2be   :  { %v686_v2 = vadd.f32 %v671_v41, %v670_v49  ;;  %v3770_v3 = vadd.f32 %v3752_v42, %v563_v1 }
 0x2bf   :  { %v635_v4 = vmul.f32 0.0, %v3767_v0 }
 0x2c0   :  { %v634_v5 = vmul.f32 0.0, %v3770_v3  ;;  %v2739_v6 = vpop.f32.mrb[20].mxu0 }
 0x2c1   :  { %v3775_v7 = vadd.f32 %v2739_v6, %v3752_v42  ;;  %v573_v8 = vpop.f32.mrb[21].mxu0  ;;  %v673_v13 = vmul.f32 %v635_v4, %v3767_v0 }
 0x2c2   :  { %v649_v10 = vadd.f32 %v648_v48, %v634_v5  ;;  %v672_v11 = vmul.f32 %v634_v5, %v3770_v3  ;;  %v3779_v12 = vadd.f32 %v3752_v42, %v573_v8 }
 0x2c3   :  { %v637_v14 = vmul.f32 0.0, %v3775_v7 }
 0x2c4   :  { %v687_v18 = vadd.f32 %v686_v2, %v672_v11  ;;  %v636_v19 = vmul.f32 0.0, %v3779_v12  ;;  %v650_v20 = vadd.f32 %v649_v10, %v635_v4  ;;  %v2742_v21 = vpop.f32.mrb[22].mxu0  ;;  %v3266_v4 = vpack.c.bf16 %v954_v43, %v953_v40 }
 0x2c5   :  { %v3803_v26 = vadd.f32 %v2742_v21, %v3752_v42  ;;  %v583_v27 = vpop.f32.mrb[23].mxu0  ;;  %v675_v33 = vmul.f32 %v637_v14, %v3775_v7 }
 0x2c6   :  { %v651_v29 = vadd.f32 %v650_v20, %v636_v19  ;;  %v674_v30 = vmul.f32 %v636_v19, %v3779_v12  ;;  %v688_v31 = vadd.f32 %v687_v18, %v673_v13  ;;  %v3807_v32 = vadd.f32 %v3752_v42, %v583_v27  ;;  %v955_v13 = vld [vmem:[%s4453_s3 + $0x40] sm:$0xff]  ;;  %3267 = vmatprep.subr.bf16.mxu0 %v3266_v4 }
 0x2c7   :  { %v639_v36 = vmul.f32 0.0, %v3803_v26  ;;  %3269 = vmatpush3.bf16.msra.mxu0 %v3266_v4 }
 0x2c8   :  { %v689_v35 = vadd.f32 %v688_v31, %v674_v30  ;;  %v638_v37 = vmul.f32 0.0, %v3807_v32  ;;  %v652_v38 = vadd.f32 %v651_v29, %v637_v14  ;;  %v2745_v39 = vpop.f32.mrb[24].mxu0  ;;  %v956_v14 = vld [vmem:[%s4453_s3 + $0x48] sm:$0xff]  ;;  %v957_v29 = vld [vmem:[%s4453_s3 + $0x50] sm:$0xff]  ;;  %v958_v30 = vld [vmem:[%s4453_s3 + $0x58] sm:$0xff] }
 0x2c9   :  { %v3819_v46 = vadd.f32 %v2745_v39, %v3752_v42  ;;  %v593_v41 = vpop.f32.mrb[25].mxu0  ;;  %v677_v5 = vmul.f32 %v639_v36, %v3803_v26  ;;  %v3270_v22 = vpack.c.bf16 %v956_v14, %v955_v13  ;;  %v3274_v39 = vpack.c.bf16 %v958_v30, %v957_v29 }
 0x2ca   :  { %v653_v48 = vadd.f32 %v652_v38, %v638_v37  ;;  %v676_v49 = vmul.f32 %v638_v37, %v3807_v32  ;;  %v690_v51 = vadd.f32 %v689_v35, %v675_v33  ;;  %v3823_v1 = vadd.f32 %v3752_v42, %v593_v41 }
 0x2cb   :  { %v641_v2 = vmul.f32 0.0, %v3819_v46  ;;  %3271 = vmatprep.subr.bf16.mxu0 %v3270_v22 }
 0x2cc   :  { %v691_v6 = vadd.f32 %v690_v51, %v676_v49  ;;  %v640_v8 = vmul.f32 0.0, %v3823_v1  ;;  %v654_v10 = vadd.f32 %v653_v48, %v639_v36  ;;  %v2748_v11 = vpop.f32.mrb[26].mxu0  ;;  %v959_v51 = vld [vmem:[%s4453_s3 + $0x60] sm:$0xff]  ;;  %3273 = vmatpush3.bf16.msra.mxu0 %v3270_v22 }
 0x2cd   :  { %v3835_v15 = vadd.f32 %v2748_v11, %v3752_v42  ;;  %v603_v16 = vpop.f32.mrb[27].mxu0  ;;  %v679_v21 = vmul.f32 %v641_v2, %v3819_v46  ;;  %3275 = vmatprep.subr.bf16.mxu0 %v3274_v39 }
 0x2ce   :  { %v655_v17 = vadd.f32 %v654_v10, %v640_v8  ;;  %v678_v18 = vmul.f32 %v640_v8, %v3823_v1  ;;  %v692_v19 = vadd.f32 %v691_v6, %v677_v5  ;;  %v3839_v20 = vadd.f32 %v3752_v42, %v603_v16 }
 0x2cf   :  { %v643_v24 = vmul.f32 0.0, %v3835_v15 }
 0x2d0   :  { %v693_v23 = vadd.f32 %v692_v19, %v678_v18  ;;  %v642_v25 = vmul.f32 0.0, %v3839_v20  ;;  %v656_v27 = vadd.f32 %v655_v17, %v641_v2  ;;  %v2751_v28 = vpop.f32.mrb[28].mxu0  ;;  %v960_v2 = vld [vmem:[%s4453_s3 + $0x68] sm:$0xff]  ;;  %3277 = vmatpush3.bf16.msra.mxu0 %v3274_v39 }
 0x2d1   :  { %v3851_v31 = vadd.f32 %v2751_v28, %v3752_v42  ;;  %v613_v33 = vpop.f32.mrb[29].mxu0  ;;  %v681_v40 = vmul.f32 %v643_v24, %v3835_v15  ;;  %v3278_v14 = vpack.c.bf16 %v960_v2, %v959_v51 }
 0x2d2   :  { %v657_v34 = vadd.f32 %v656_v27, %v642_v25  ;;  %v680_v35 = vmul.f32 %v642_v25, %v3839_v20  ;;  %v694_v36 = vadd.f32 %v693_v23, %v679_v21  ;;  %v3855_v37 = vadd.f32 %v3752_v42, %v613_v33  ;;  %v961_v21 = vld [vmem:[%s4453_s3 + $0x70] sm:$0xff]  ;;  %v962_v23 = vld [vmem:[%s4453_s3 + $0x78] sm:$0xff] }
 0x2d3   :  { %v645_v38 = vmul.f32 0.0, %v3851_v31  ;;  %3279 = vmatprep.subr.bf16.mxu0 %v3278_v14  ;;  %v3282_v29 = vpack.c.bf16 %v962_v23, %v961_v21 }
 0x2d4   :  { %v695_v43 = vadd.f32 %v694_v36, %v680_v35  ;;  %v644_v41 = vmul.f32 0.0, %v3855_v37  ;;  %v658_v48 = vadd.f32 %v657_v34, %v643_v24  ;;  %v2754_v49 = vpop.f32.mrb[30].mxu0  ;;  %3281 = vmatpush3.bf16.msra.mxu0 %v3278_v14 }
 0x2d5   :  { %v3867_v5 = vadd.f32 %v2754_v49, %v3752_v42  ;;  %v623_v4 = vpop.f32.mrb[31].mxu0  ;;  %v683_v13 = vmul.f32 %v645_v38, %v3851_v31  ;;  %3283 = vmatprep.subr.bf16.mxu0 %v3282_v29 }
 0x2d6   :  { %v659_v6 = vadd.f32 %v658_v48, %v644_v41  ;;  %v682_v8 = vmul.f32 %v644_v41, %v3855_v37  ;;  %v696_v10 = vadd.f32 %v695_v43, %v681_v40  ;;  %v624_v11 = vadd.f32 %v3752_v42, %v623_v4 }
 0x2d7   :  { %v647_v17 = vmul.f32 0.0, %v3867_v5 }
 0x2d8   :  { %v697_v16 = vadd.f32 %v696_v10, %v682_v8  ;;  %v646_v18 = vmul.f32 0.0, %v624_v11  ;;  %v660_v19 = vadd.f32 %v659_v6, %v645_v38  ;;  %3285 = vmatpush3.bf16.msra.mxu0 %v3282_v29 }
 0x2d9   :  { %v685_v22 = vmul.f32 %v647_v17, %v3867_v5 }
 0x2da   :  { %v661_v24 = vadd.f32 %v660_v19, %v646_v18  ;;  %v684_v42 = vmul.f32 %v646_v18, %v624_v11  ;;  %v698_v25 = vadd.f32 %v697_v16, %v683_v13 }
 0x2dc   :  { %v662_v27 = vadd.f32 %v661_v24, %v647_v17  ;;  %v699_v28 = vadd.f32 %v698_v25, %v684_v42 }
 0x2de   :  { %v663_v30 = vrot.slane %v662_v27, 4  ;;  %v700_v33 = vadd.f32 %v699_v28, %v685_v22 }
 0x2e0   :  { %v664_v34 = vadd.f32 %v663_v30, %v662_v27  ;;  %v701_v35 = vrot.slane %v700_v33, 4 }
 0x2e2   :  { %v665_v36 = vrot.slane %v664_v34, 2  ;;  %v702_v38 = vadd.f32 %v701_v35, %v700_v33 }
 0x2e4   :  { %v666_v40 = vadd.f32 %v665_v36, %v664_v34  ;;  %v703_v43 = vrot.slane %v702_v38, 2 }
 0x2e6   :  { %v667_v41 = vrot.slane %v666_v40, 1  ;;  %v704_v48 = vadd.f32 %v703_v43, %v702_v38 }
 0x2e8   :  { %v668_v39 = vadd.f32 %v667_v41, %v666_v40  ;;  %v705_v49 = vrot.slane %v704_v48, 1 }
 0x2ea   :  { %v3880_v51 = vmul.f32 0.0625, %v668_v39  ;;  %v706_v2 = vadd.f32 %v705_v49, %v704_v48 }
 0x2ec   :  { %v707_v4 = vmul.f32 0.0625, %v706_v2  ;;  %v708_v6 = vmul.f32 %v3880_v51, %v3880_v51  ;;  %v724_v8 = vsub.f32 %v624_v11, %v3880_v51  ;;  %v710_v10 = vsub.f32 %v3758_v9, %v3880_v51 }
 0x2ed   :  { %v711_v13 = vsub.f32 %v3755_v44, %v3880_v51  ;;  %v712_v14 = vsub.f32 %v3770_v3, %v3880_v51  ;;  %v713_v16 = vsub.f32 %v3767_v0, %v3880_v51  ;;  %v714_v17 = vsub.f32 %v3779_v12, %v3880_v51 }
 0x2ee   :  { %v709_v18 = vsub.f32 %v707_v4, %v708_v6  ;;  %v715_v19 = vsub.f32 %v3775_v7, %v3880_v51  ;;  %v716_v11 = vsub.f32 %v3807_v32, %v3880_v51  ;;  %v717_v9 = vsub.f32 %v3803_v26, %v3880_v51 }
 0x2ef   :  { %v718_v44 = vsub.f32 %v3823_v1, %v3880_v51  ;;  %v719_v3 = vsub.f32 %v3819_v46, %v3880_v51  ;;  %v720_v0 = vsub.f32 %v3839_v20, %v3880_v51  ;;  %v721_v12 = vsub.f32 %v3835_v15, %v3880_v51  ;;  %v2216_v46 = vld [vmem:[%s4455_s5 + $0x2] ss:$0 sm:$0xff] }
 0x2f0   :  { %v726_v21 = vadd.f32 1e-05, %v709_v18  ;;  %v722_v7 = vsub.f32 %v3855_v37, %v3880_v51  ;;  %v723_v32 = vsub.f32 %v3851_v31, %v3880_v51  ;;  %v725_v26 = vsub.f32 %v3867_v5, %v3880_v51  ;;  %v3921_v37 = vld [vmem:[%s4455_s5 + $0x3] ss:$0 sm:$0xff] }
 0x2f2   :  { %3444 = vrsqrt.f32 %v726_v21 }
 0x2fc   :  { %v3445_v1 = vpop.eup %3444 }
 0x2fd   :  { %v742_v20 = vmul.f32 %v3445_v1, %v724_v8  ;;  %v728_v23 = vmul.f32 %v3445_v1, %v710_v10  ;;  %v729_v24 = vmul.f32 %v3445_v1, %v711_v13  ;;  %v730_v15 = vmul.f32 %v3445_v1, %v712_v14 }
 0x2fe   :  { %v731_v42 = vmul.f32 %v3445_v1, %v713_v16  ;;  %v732_v31 = vmul.f32 %v3445_v1, %v714_v17  ;;  %v733_v25 = vmul.f32 %v3445_v1, %v715_v19  ;;  %v734_v22 = vmul.f32 %v3445_v1, %v716_v11 }
 0x2ff   :  { %v749_v5 = vmul.f32 %v2216_v46, %v728_v23  ;;  %v750_v27 = vmul.f32 %v2216_v46, %v729_v24  ;;  %v751_v28 = vmul.f32 %v2216_v46, %v730_v15  ;;  %v735_v29 = vmul.f32 %v3445_v1, %v717_v9 }
 0x300   :  { %v752_v30 = vmul.f32 %v2216_v46, %v731_v42  ;;  %v753_v33 = vmul.f32 %v2216_v46, %v732_v31  ;;  %v754_v34 = vmul.f32 %v2216_v46, %v733_v25  ;;  %v755_v35 = vmul.f32 %v2216_v46, %v734_v22 }
 0x301   :  { %v770_v36 = vadd.f32 %v3921_v37, %v749_v5  ;;  %v771_v38 = vadd.f32 %v3921_v37, %v750_v27  ;;  %v772_v40 = vadd.f32 %v3921_v37, %v751_v28  ;;  %v756_v43 = vmul.f32 %v2216_v46, %v735_v29 }
 0x302   :  { %v773_v41 = vadd.f32 %v3921_v37, %v752_v30  ;;  %v774_v48 = vadd.f32 %v3921_v37, %v753_v33  ;;  %v775_v39 = vadd.f32 %v3921_v37, %v754_v34  ;;  %v776_v49 = vadd.f32 %v3921_v37, %v755_v35 }
 0x303   :  { %v786_v51 = vmax.f32 %v770_v36, 0.0  ;;  %v787_v2 = vmax.f32 %v771_v38, 0.0  ;;  %v788_v4 = vmax.f32 %v772_v40, 0.0  ;;  %v777_v6 = vadd.f32 %v3921_v37, %v756_v43 }
 0x304   :  { %v789_v8 = vmax.f32 %v773_v41, 0.0  ;;  %v790_v10 = vmax.f32 %v774_v48, 0.0  ;;  %v791_v13 = vmax.f32 %v775_v39, 0.0  ;;  %v792_v14 = vmax.f32 %v776_v49, 0.0 }
 0x305   :  { %v3222_v16 = vpack.c.bf16 %v787_v2, %v786_v51  ;;  %v793_v17 = vmax.f32 %v777_v6, 0.0  ;;  %v736_v18 = vmul.f32 %v3445_v1, %v718_v44  ;;  %v737_v19 = vmul.f32 %v3445_v1, %v719_v3  ;;  %v2231_v51 = vld [vmem:[%s4454_s4 + $0xd8] sm:$0xff]  ;;  %v2233_v6 = vld [vmem:[%s4454_s4 + $0xe8] sm:$0xff] }
 0x306   :  { %v3226_v11 = vpack.c.bf16 %v789_v8, %v788_v4  ;;  %v3230_v9 = vpack.c.bf16 %v791_v13, %v790_v10  ;;  %v738_v21 = vmul.f32 %v3445_v1, %v720_v0  ;;  %v739_v23 = vmul.f32 %v3445_v1, %v721_v12  ;;  %v2232_v4 = vld [vmem:[%s4454_s4 + $0xe0] sm:$0xff] }
 0x307   :  { %3223 = vmatprep.subr.bf16.mxu1 %v3222_v16  ;;  %v3234_v24 = vpack.c.bf16 %v793_v17, %v792_v14  ;;  %v757_v15 = vmul.f32 %v2216_v46, %v736_v18  ;;  %v758_v42 = vmul.f32 %v2216_v46, %v737_v19  ;;  %v740_v31 = vmul.f32 %v3445_v1, %v722_v7 }
 0x308   :  { %3225 = vmatpush3.bf16.msra.mxu1 %v3222_v16  ;;  %v759_v25 = vmul.f32 %v2216_v46, %v738_v21  ;;  %v760_v22 = vmul.f32 %v2216_v46, %v739_v23  ;;  %v741_v5 = vmul.f32 %v3445_v1, %v723_v32  ;;  %v743_v27 = vmul.f32 %v3445_v1, %v725_v26 }
 0x309   :  { %3227 = vmatprep.subr.bf16.mxu1 %v3226_v11  ;;  %v778_v28 = vadd.f32 %v3921_v37, %v757_v15  ;;  %v779_v44 = vadd.f32 %v3921_v37, %v758_v42  ;;  %v761_v3 = vmul.f32 %v2216_v46, %v740_v31  ;;  %v763_v29 = vmul.f32 %v2216_v46, %v742_v20 }
 0x30a   :  { %v780_v0 = vadd.f32 %v3921_v37, %v759_v25  ;;  %v781_v12 = vadd.f32 %v3921_v37, %v760_v22  ;;  %v762_v30 = vmul.f32 %v2216_v46, %v741_v5  ;;  %v764_v33 = vmul.f32 %v2216_v46, %v743_v27  ;;  %v3450_v22 = vld [vmem:[#allocation2] sm:$0xff]  ;;  %v2234_v5 = vld [vmem:[%s4454_s4 + $0xf0] sm:$0xff]  ;;  %v2235_v27 = vld [vmem:[%s4454_s4 + $0xf8] sm:$0xff] }
 0x30b   :  { %v794_v34 = vmax.f32 %v778_v28, 0.0  ;;  %v795_v7 = vmax.f32 %v779_v44, 0.0  ;;  %v782_v35 = vadd.f32 %v3921_v37, %v761_v3  ;;  %v784_v32 = vadd.f32 %v3921_v37, %v763_v29  ;;  %v2219_v44 = vld [vmem:[%s4455_s5 + $0x8] ss:$0 sm:$0xff] }
 0x30c   :  { %3229 = vmatpush3.bf16.msra.mxu1 %v3226_v11  ;;  %v796_v26 = vmax.f32 %v780_v0, 0.0  ;;  %v797_v1 = vmax.f32 %v781_v12, 0.0  ;;  %v783_v36 = vadd.f32 %v3921_v37, %v762_v30  ;;  %v785_v38 = vadd.f32 %v3921_v37, %v764_v33  ;;  %v2230_v37 = vld [vmem:[%s4454_s4 + $0xd0] sm:$0xff] }
 0x30d   :  { %3231 = vmatprep.subr.bf16.mxu1 %v3230_v9  ;;  %v3238_v20 = vpack.c.bf16 %v795_v7, %v794_v34  ;;  %v798_v40 = vmax.f32 %v782_v35, 0.0  ;;  %v800_v43 = vmax.f32 %v784_v32, 0.0  ;;  %v3306_v2 = vpack.c.bf16 %v2231_v51, %v2230_v37 }
 0x30e   :  { %v3242_v41 = vpack.c.bf16 %v797_v1, %v796_v26  ;;  %v799_v48 = vmax.f32 %v783_v36, 0.0  ;;  %v801_v46 = vmax.f32 %v785_v38, 0.0  ;;  %v3310_v8 = vpack.c.bf16 %v2233_v6, %v2232_v4 }
 0x30f   :  { %v3314_v28 = vpack.c.bf16 %v2235_v27, %v2234_v5 }
 0x310   :  { %3233 = vmatpush3.bf16.msra.mxu1 %v3230_v9  ;;  %v3246_v39 = vpack.c.bf16 %v799_v48, %v798_v40  ;;  %v3250_v49 = vpack.c.bf16 %v801_v46, %v800_v43 }
 0x311   :  { %3235 = vmatprep.subr.bf16.mxu1 %v3234_v24 }
 0x314   :  { %3237 = vmatpush3.bf16.msra.mxu1 %v3234_v24 }
 0x315   :  { %3239 = vmatprep.subr.bf16.mxu1 %v3238_v20 }
 0x318   :  { %3241 = vmatpush3.bf16.msra.mxu1 %v3238_v20 }
 0x319   :  { %3243 = vmatprep.subr.bf16.mxu1 %v3242_v41 }
 0x31c   :  { %3245 = vmatpush3.bf16.msra.mxu1 %v3242_v41 }
 0x31d   :  { %3247 = vmatprep.subr.bf16.mxu1 %v3246_v39 }
 0x320   :  { %3249 = vmatpush3.bf16.msra.mxu1 %v3246_v39 }
 0x321   :  { %3251 = vmatprep.subr.bf16.mxu1 %v3250_v49 }
 0x324   :  { %3253 = vmatpush3.bf16.msra.mxu1 %v3250_v49 }
 0x327   :  { %2788 = vmatmul.mubr.f32.vlgmr.msra.gmra.mrb[16].mxu1 %v3646_v45  ;;  %v2220_v45 = vld [vmem:[%s4454_s4 + $0x80] sm:$0xff] }
 0x328   :  { %2790 = vmatprep.mubr.f32.mxu1 %v3648_v47  ;;  %v2221_v47 = vld [vmem:[%s4454_s4 + $0x88] sm:$0xff] }
 0x32b   :  { %2791 = vmatmul.mubr.f32.gmra.mrb[18].mxu1 %v3658_v50  ;;  %v2222_v50 = vld [vmem:[%s4454_s4 + $0x90] sm:$0xff] }
 0x32c   :  { %2793 = vmatprep.mubr.f32.mxu1 %v3660_v52  ;;  %v3286_v52 = vpack.c.bf16 %v2221_v47, %v2220_v45 }
 0x32e   :  { %3287 = vmatprep.subr.bf16.mxu1 %v3286_v52 }
 0x32f   :  { %2794 = vmatmul.mubr.f32.gmra.mrb[20].mxu1 %v3664_v53  ;;  %v2223_v53 = vld [vmem:[%s4454_s4 + $0x98] sm:$0xff] }
 0x330   :  { %2796 = vmatprep.mubr.f32.mxu1 %v3666_v54  ;;  %v3290_v54 = vpack.c.bf16 %v2223_v53, %v2222_v50  ;;  %3289 = vmatpush3.bf16.msra.mxu1 %v3286_v52 }
 0x332   :  { %3291 = vmatprep.subr.bf16.mxu1 %v3290_v54 }
 0x333   :  { %2797 = vmatmul.mubr.f32.gmra.mrb[22].mxu1 %v3670_v55  ;;  %v2224_v55 = vld [vmem:[%s4454_s4 + $0xa0] sm:$0xff] }
 0x334   :  { %2799 = vmatprep.mubr.f32.mxu1 %v3672_v56  ;;  %v2225_v56 = vld [vmem:[%s4454_s4 + $0xa8] sm:$0xff]  ;;  %3293 = vmatpush3.bf16.msra.mxu1 %v3290_v54 }
 0x337   :  { %2800 = vmatmul.mubr.f32.gmra.mrb[24].mxu1 %v3676_v57  ;;  %v3294_v57 = vpack.c.bf16 %v2225_v56, %v2224_v55 }
 0x338   :  { %2802 = vmatprep.mubr.f32.mxu1 %v3678_v58  ;;  %v2226_v58 = vld [vmem:[%s4454_s4 + $0xb0] sm:$0xff] }
 0x339   :  { %3295 = vmatprep.subr.bf16.mxu1 %v3294_v57 }
 0x33a   :  { %3297 = vmatpush3.bf16.msra.mxu1 %v3294_v57 }
 0x33b   :  { %2803 = vmatmul.mubr.f32.gmra.mrb[26].mxu1 %v3682_v59  ;;  %v2227_v59 = vld [vmem:[%s4454_s4 + $0xb8] sm:$0xff] }
 0x33c   :  { %2805 = vmatprep.mubr.f32.mxu1 %v3684_v60  ;;  %v3298_v60 = vpack.c.bf16 %v2227_v59, %v2226_v58 }
 0x33e   :  { %3299 = vmatprep.subr.bf16.mxu1 %v3298_v60 }
 0x33f   :  { %2806 = vmatmul.mubr.f32.gmra.mrb[28].mxu1 %v3688_v61  ;;  %v2228_v61 = vld [vmem:[%s4454_s4 + $0xc0] sm:$0xff] }
 0x340   :  { %2808 = vmatprep.mubr.f32.mxu1 %v3690_v62  ;;  %v2229_v62 = vld [vmem:[%s4454_s4 + $0xc8] sm:$0xff]  ;;  %3301 = vmatpush3.bf16.msra.mxu1 %v3298_v60 }
 0x343   :  { %2809 = vmatmul.mubr.f32.gmra.mrb[30].mxu1 %v3694_v63  ;;  %v3302_v63 = vpack.c.bf16 %v2229_v62, %v2228_v61 }
 0x345   :  { %3303 = vmatprep.subr.bf16.mxu1 %v3302_v63 }
 0x346   :  { %3305 = vmatpush3.bf16.msra.mxu1 %v3302_v63 }
 0x347   :  { %3307 = vmatprep.subr.bf16.mxu1 %v3306_v2 }
 0x34a   :  { %3309 = vmatpush3.bf16.msra.mxu1 %v3306_v2 }
 0x34b   :  { %3311 = vmatprep.subr.bf16.mxu1 %v3310_v8 }
 0x34e   :  { %3313 = vmatpush3.bf16.msra.mxu1 %v3310_v8 }
 0x34f   :  { %3315 = vmatprep.subr.bf16.mxu1 %v3314_v28 }
 0x352   :  { %3317 = vmatpush3.bf16.msra.mxu1 %v3314_v28 }
 0x3fa   :  { %v2789_v10 = vpop.f32.mrb[16].mxu1 }
 0x3fb   :  { %v868_v13 = vpop.f32.mrb[17].mxu1 }
 0x3fc   :  { %2843 = vmatprep.mubr.f32.mxu0 %v868_v13 }
 0x3fd   :  { %2844 = vmatmul.mubr.f32.vlgmr.msra.gmra.mrb[32].mxu0 %v2789_v10 }
 0x3fe   :  { %v2792_v14 = vpop.f32.mrb[18].mxu1 }
 0x3ff   :  { %v878_v16 = vpop.f32.mrb[19].mxu1 }
 0x400   :  { %2846 = vmatprep.mubr.f32.mxu0 %v878_v16 }
 0x401   :  { %2847 = vmatmul.mubr.f32.gmra.mrb[34].mxu0 %v2792_v14 }
 0x402   :  { %v2795_v17 = vpop.f32.mrb[20].mxu1 }
 0x403   :  { %v888_v18 = vpop.f32.mrb[21].mxu1 }
 0x404   :  { %2849 = vmatprep.mubr.f32.mxu0 %v888_v18  ;;  %v4008_v18 = vld [vmem:[%s4455_s5 + $0x9] ss:$0 sm:$0xff] }
 0x405   :  { %2850 = vmatmul.mubr.f32.gmra.mrb[36].mxu0 %v2795_v17 }
 0x406   :  { %v2798_v19 = vpop.f32.mrb[22].mxu1 }
 0x407   :  { %v898_v11 = vpop.f32.mrb[23].mxu1 }
 0x408   :  { %2852 = vmatprep.mubr.f32.mxu0 %v898_v11 }
 0x409   :  { %2853 = vmatmul.mubr.f32.gmra.mrb[38].mxu0 %v2798_v19 }
 0x40a   :  { %v2801_v9 = vpop.f32.mrb[24].mxu1 }
 0x40b   :  { %v908_v21 = vpop.f32.mrb[25].mxu1 }
 0x40c   :  { %2855 = vmatprep.mubr.f32.mxu0 %v908_v21 }
 0x40d   :  { %2856 = vmatmul.mubr.f32.gmra.mrb[40].mxu0 %v2801_v9 }
 0x40e   :  { %v2804_v23 = vpop.f32.mrb[26].mxu1 }
 0x40f   :  { %v918_v24 = vpop.f32.mrb[27].mxu1 }
 0x410   :  { %2858 = vmatprep.mubr.f32.mxu0 %v918_v24 }
 0x411   :  { %2859 = vmatmul.mubr.f32.gmra.mrb[42].mxu0 %v2804_v23 }
 0x412   :  { %v2807_v15 = vpop.f32.mrb[28].mxu1 }
 0x413   :  { %v928_v42 = vpop.f32.mrb[29].mxu1 }
 0x414   :  { %2861 = vmatprep.mubr.f32.mxu0 %v928_v42 }
 0x415   :  { %2862 = vmatmul.mubr.f32.gmra.mrb[44].mxu0 %v2807_v15 }
 0x416   :  { %v2810_v31 = vpop.f32.mrb[30].mxu1 }
 0x417   :  { %v938_v25 = vpop.f32.mrb[31].mxu1 }
 0x418   :  { %2864 = vmatprep.mubr.f32.mxu0 %v938_v25 }
 0x419   :  { %2865 = vmatmul.mubr.f32.gmra.mrb[46].mxu0 %v2810_v31 }
 0x41a   :  { %2955 = vmatprep.mubr.f32.mxu0 %v3450_v22 }
 0x4d0   :  { %v2845_v3 = vpop.f32.mrb[32].mxu0 }
 0x4d1   :  { %v1041_v29 = vadd.f32 %v2845_v3, %v2219_v44  ;;  %v1035_v0 = vpop.f32.mrb[33].mxu0 }
 0x4d2   :  { %v1036_v12 = vadd.f32 %v2219_v44, %v1035_v0 }
 0x4d3   :  { %v1115_v34 = vmax.f32 %v1041_v29, 0.0 }
 0x4d4   :  { %v1114_v30 = vmax.f32 %v1036_v12, 0.0  ;;  %v2848_v33 = vpop.f32.mrb[34].mxu0 }
 0x4d5   :  { %v1051_v7 = vadd.f32 %v2848_v33, %v2219_v44  ;;  %v1045_v35 = vpop.f32.mrb[35].mxu0 }
 0x4d6   :  { %v1046_v32 = vadd.f32 %v2219_v44, %v1045_v35  ;;  %2899 = vmatprep.mubr.f32.mxu1 %v1114_v30  ;;  %v2243_v35 = vld [vmem:[%s4453_s3 + $0x88] sm:$0xff] }
 0x4d7   :  { %2900 = vmatmul.mubr.f32.vlgmr.msra.gmra.mrb[32].mxu1 %v1115_v34  ;;  %v1117_v36 = vmax.f32 %v1051_v7, 0.0  ;;  %v2242_v7 = vld [vmem:[%s4453_s3 + $0x80] sm:$0xff] }
 0x4d8   :  { %v1116_v26 = vmax.f32 %v1046_v32, 0.0  ;;  %v2851_v1 = vpop.f32.mrb[36].mxu0  ;;  %v2244_v32 = vld [vmem:[%s4453_s3 + $0x90] sm:$0xff] }
 0x4d9   :  { %v1061_v38 = vadd.f32 %v2851_v1, %v2219_v44  ;;  %v1055_v20 = vpop.f32.mrb[37].mxu0 }
 0x4da   :  { %v1056_v40 = vadd.f32 %v2219_v44, %v1055_v20  ;;  %2902 = vmatprep.mubr.f32.mxu1 %v1116_v26  ;;  %v3350_v20 = vpack.c.bf16 %v2243_v35, %v2242_v7 }
 0x4db   :  { %2903 = vmatmul.mubr.f32.gmra.mrb[34].mxu1 %v1117_v36  ;;  %v1119_v48 = vmax.f32 %v1061_v38, 0.0 }
 0x4dc   :  { %v1118_v43 = vmax.f32 %v1056_v40, 0.0  ;;  %v2854_v41 = vpop.f32.mrb[38].mxu0  ;;  %v2245_v40 = vld [vmem:[%s4453_s3 + $0x98] sm:$0xff]  ;;  %3351 = vmatprep.subr.bf16.mxu1 %v3350_v20 }
 0x4dd   :  { %v1071_v46 = vadd.f32 %v2854_v41, %v2219_v44  ;;  %v1065_v39 = vpop.f32.mrb[39].mxu0  ;;  %v2247_v41 = vld [vmem:[%s4453_s3 + $0xa8] sm:$0xff]  ;;  %3353 = vmatpush3.bf16.msra.mxu1 %v3350_v20 }
 0x4de   :  { %v1066_v49 = vadd.f32 %v2219_v44, %v1065_v39  ;;  %2905 = vmatprep.mubr.f32.mxu1 %v1118_v43  ;;  %v2246_v43 = vld [vmem:[%s4453_s3 + $0xa0] sm:$0xff]  ;;  %v3354_v39 = vpack.c.bf16 %v2245_v40, %v2244_v32 }
 0x4df   :  { %2906 = vmatmul.mubr.f32.gmra.mrb[36].mxu1 %v1119_v48  ;;  %v1121_v50 = vmax.f32 %v1071_v46, 0.0 }
 0x4e0   :  { %v1120_v45 = vmax.f32 %v1066_v49, 0.0  ;;  %v2857_v47 = vpop.f32.mrb[40].mxu0  ;;  %3355 = vmatprep.subr.bf16.mxu1 %v3354_v39 }
 0x4e1   :  { %v1081_v52 = vadd.f32 %v2857_v47, %v2219_v44  ;;  %v1075_v53 = vpop.f32.mrb[41].mxu0  ;;  %3357 = vmatpush3.bf16.msra.mxu1 %v3354_v39 }
 0x4e2   :  { %v1076_v54 = vadd.f32 %v2219_v44, %v1075_v53  ;;  %2908 = vmatprep.mubr.f32.mxu1 %v1120_v45  ;;  %v3358_v53 = vpack.c.bf16 %v2247_v41, %v2246_v43 }
 0x4e3   :  { %2909 = vmatmul.mubr.f32.gmra.mrb[38].mxu1 %v1121_v50  ;;  %v1123_v57 = vmax.f32 %v1081_v52, 0.0 }
 0x4e4   :  { %v1122_v55 = vmax.f32 %v1076_v54, 0.0  ;;  %v2860_v56 = vpop.f32.mrb[42].mxu0  ;;  %3359 = vmatprep.subr.bf16.mxu1 %v3358_v53 }
 0x4e5   :  { %v1091_v58 = vadd.f32 %v2860_v56, %v2219_v44  ;;  %v1085_v59 = vpop.f32.mrb[43].mxu0  ;;  %3361 = vmatpush3.bf16.msra.mxu1 %v3358_v53 }
 0x4e6   :  { %v1086_v60 = vadd.f32 %v2219_v44, %v1085_v59  ;;  %2911 = vmatprep.mubr.f32.mxu1 %v1122_v55  ;;  %v2248_v59 = vld [vmem:[%s4453_s3 + $0xb0] sm:$0xff] }
 0x4e7   :  { %2912 = vmatmul.mubr.f32.gmra.mrb[40].mxu1 %v1123_v57  ;;  %v1125_v63 = vmax.f32 %v1091_v58, 0.0 }
 0x4e8   :  { %v1124_v61 = vmax.f32 %v1086_v60, 0.0  ;;  %v2863_v62 = vpop.f32.mrb[44].mxu0  ;;  %v2249_v60 = vld [vmem:[%s4453_s3 + $0xb8] sm:$0xff] }
 0x4e9   :  { %v1101_v37 = vadd.f32 %v2863_v62, %v2219_v44  ;;  %v1095_v51 = vpop.f32.mrb[45].mxu0 }
 0x4ea   :  { %v1096_v2 = vadd.f32 %v2219_v44, %v1095_v51  ;;  %2914 = vmatprep.mubr.f32.mxu1 %v1124_v61 }
 0x4eb   :  { %2915 = vmatmul.mubr.f32.gmra.mrb[42].mxu1 %v1125_v63  ;;  %v1127_v8 = vmax.f32 %v1101_v37, 0.0 }
 0x4ec   :  { %v1126_v4 = vmax.f32 %v1096_v2, 0.0  ;;  %v2866_v6 = vpop.f32.mrb[46].mxu0 }
 0x4ed   :  { %v1111_v10 = vadd.f32 %v2866_v6, %v2219_v44  ;;  %v1105_v13 = vpop.f32.mrb[47].mxu0  ;;  %v3362_v6 = vpack.c.bf16 %v2249_v60, %v2248_v59 }
 0x4ee   :  { %v1106_v14 = vadd.f32 %v2219_v44, %v1105_v13  ;;  %2917 = vmatprep.mubr.f32.mxu1 %v1126_v4 }
 0x4ef   :  { %2918 = vmatmul.mubr.f32.gmra.mrb[44].mxu1 %v1127_v8  ;;  %v1129_v17 = vmax.f32 %v1111_v10, 0.0  ;;  %3363 = vmatprep.subr.bf16.mxu1 %v3362_v6 }
 0x4f0   :  { %v1128_v16 = vmax.f32 %v1106_v14, 0.0  ;;  %3365 = vmatpush3.bf16.msra.mxu1 %v3362_v6 }
 0x4f2   :  { %2920 = vmatprep.mubr.f32.mxu1 %v1128_v16 }
 0x4f3   :  { %2921 = vmatmul.mubr.f32.gmra.mrb[46].mxu1 %v1129_v17  ;;  %v2250_v17 = vld [vmem:[%s4453_s3 + $0xc0] sm:$0xff] }
 0x5aa   :  { %v2901_v19 = vpop.f32.mrb[32].mxu1 }
 0x5ab   :  { %v4011_v11 = vadd.f32 %v2901_v19, %v4008_v18  ;;  %v1218_v9 = vpop.f32.mrb[33].mxu1  ;;  %v2251_v19 = vld [vmem:[%s4453_s3 + $0xc8] sm:$0xff] }
 0x5ac   :  { %v4014_v21 = vadd.f32 %v4008_v18, %v1218_v9 }
 0x5ad   :  { %v1336_v23 = vmul.f32 %v4011_v11, %v4011_v11 }
 0x5ae   :  { %v1313_v24 = vadd.f32 %v4011_v11, %v4014_v21  ;;  %v1335_v15 = vmul.f32 %v4014_v21, %v4014_v21  ;;  %v2904_v42 = vpop.f32.mrb[34].mxu1 }
 0x5af   :  { %v4023_v31 = vadd.f32 %v2904_v42, %v4008_v18  ;;  %v1228_v25 = vpop.f32.mrb[35].mxu1 }
 0x5b0   :  { %v1351_v22 = vadd.f32 %v1336_v23, %v1335_v15  ;;  %v4026_v5 = vadd.f32 %v4008_v18, %v1228_v25 }
 0x5b1   :  { %v1300_v27 = vmul.f32 0.0, %v4023_v31 }
 0x5b2   :  { %v1299_v28 = vmul.f32 0.0, %v4026_v5  ;;  %v2907_v44 = vpop.f32.mrb[36].mxu1 }
 0x5b3   :  { %v4031_v3 = vadd.f32 %v2907_v44, %v4008_v18  ;;  %v1238_v29 = vpop.f32.mrb[37].mxu1  ;;  %v1338_v33 = vmul.f32 %v1300_v27, %v4023_v31 }
 0x5b4   :  { %v1314_v0 = vadd.f32 %v1313_v24, %v1299_v28  ;;  %v1337_v12 = vmul.f32 %v1299_v28, %v4026_v5  ;;  %v4035_v30 = vadd.f32 %v4008_v18, %v1238_v29 }
 0x5b5   :  { %v1302_v34 = vmul.f32 0.0, %v4031_v3 }
 0x5b6   :  { %v1352_v26 = vadd.f32 %v1351_v22, %v1337_v12  ;;  %v1301_v1 = vmul.f32 0.0, %v4035_v30  ;;  %v1315_v36 = vadd.f32 %v1314_v0, %v1300_v27  ;;  %v2910_v38 = vpop.f32.mrb[38].mxu1  ;;  %v3366_v27 = vpack.c.bf16 %v2251_v19, %v2250_v17 }
 0x5b7   :  { %v4059_v48 = vadd.f32 %v2910_v38, %v4008_v18  ;;  %v1248_v46 = vpop.f32.mrb[39].mxu1  ;;  %v1340_v52 = vmul.f32 %v1302_v34, %v4031_v3 }
 0x5b8   :  { %v1316_v49 = vadd.f32 %v1315_v36, %v1301_v1  ;;  %v1339_v45 = vmul.f32 %v1301_v1, %v4035_v30  ;;  %v1353_v47 = vadd.f32 %v1352_v26, %v1338_v33  ;;  %v4063_v50 = vadd.f32 %v4008_v18, %v1248_v46  ;;  %v2252_v33 = vld [vmem:[%s4453_s3 + $0xd0] sm:$0xff]  ;;  %3367 = vmatprep.subr.bf16.mxu1 %v3366_v27 }
 0x5b9   :  { %v1304_v55 = vmul.f32 0.0, %v4059_v48  ;;  %3369 = vmatpush3.bf16.msra.mxu1 %v3366_v27 }
 0x5ba   :  { %v1354_v54 = vadd.f32 %v1353_v47, %v1339_v45  ;;  %v1303_v56 = vmul.f32 0.0, %v4063_v50  ;;  %v1317_v57 = vadd.f32 %v1316_v49, %v1302_v34  ;;  %v2913_v58 = vpop.f32.mrb[40].mxu1  ;;  %v2253_v34 = vld [vmem:[%s4453_s3 + $0xd8] sm:$0xff]  ;;  %v2254_v49 = vld [vmem:[%s4453_s3 + $0xe0] sm:$0xff]  ;;  %v2255_v45 = vld [vmem:[%s4453_s3 + $0xe8] sm:$0xff] }
 0x5bb   :  { %v4075_v61 = vadd.f32 %v2913_v58, %v4008_v18  ;;  %v1258_v62 = vpop.f32.mrb[41].mxu1  ;;  %v1342_v8 = vmul.f32 %v1304_v55, %v4059_v48  ;;  %v3370_v20 = vpack.c.bf16 %v2253_v34, %v2252_v33  ;;  %v3374_v58 = vpack.c.bf16 %v2255_v45, %v2254_v49 }
 0x5bc   :  { %v1318_v63 = vadd.f32 %v1317_v57, %v1303_v56  ;;  %v1341_v37 = vmul.f32 %v1303_v56, %v4063_v50  ;;  %v1355_v51 = vadd.f32 %v1354_v54, %v1340_v52  ;;  %v4079_v2 = vadd.f32 %v4008_v18, %v1258_v62 }
 0x5bd   :  { %v1306_v4 = vmul.f32 0.0, %v4075_v61  ;;  %3371 = vmatprep.subr.bf16.mxu1 %v3370_v20 }
 0x5be   :  { %v1356_v10 = vadd.f32 %v1355_v51, %v1341_v37  ;;  %v1305_v13 = vmul.f32 0.0, %v4079_v2  ;;  %v1319_v14 = vadd.f32 %v1318_v63, %v1304_v55  ;;  %v2916_v16 = vpop.f32.mrb[42].mxu1  ;;  %v2256_v37 = vld [vmem:[%s4453_s3 + $0xf0] sm:$0xff]  ;;  %v2257_v51 = vld [vmem:[%s4453_s3 + $0xf8] sm:$0xff]  ;;  %3373 = vmatpush3.bf16.msra.mxu1 %v3370_v20 }
 0x5bf   :  { %v4091_v9 = vadd.f32 %v2916_v16, %v4008_v18  ;;  %v1268_v23 = vpop.f32.mrb[43].mxu1  ;;  %v1344_v22 = vmul.f32 %v1306_v4, %v4075_v61  ;;  %3375 = vmatprep.subr.bf16.mxu1 %v3374_v58 }
 0x5c0   :  { %v1320_v24 = vadd.f32 %v1319_v14, %v1305_v13  ;;  %v1343_v15 = vmul.f32 %v1305_v13, %v4079_v2  ;;  %v1357_v42 = vadd.f32 %v1356_v10, %v1342_v8  ;;  %v4095_v25 = vadd.f32 %v4008_v18, %v1268_v23 }
 0x5c1   :  { %v1308_v44 = vmul.f32 0.0, %v4091_v9  ;;  %v3378_v14 = vpack.c.bf16 %v2257_v51, %v2256_v37 }
 0x5c2   :  { %v1358_v28 = vadd.f32 %v1357_v42, %v1343_v15  ;;  %v1307_v29 = vmul.f32 0.0, %v4095_v25  ;;  %v1321_v0 = vadd.f32 %v1320_v24, %v1306_v4  ;;  %v2919_v12 = vpop.f32.mrb[44].mxu1  ;;  %3377 = vmatpush3.bf16.msra.mxu1 %v3374_v58 }
 0x5c3   :  { %v4107_v7 = vadd.f32 %v2919_v12, %v4008_v18  ;;  %v1278_v35 = vpop.f32.mrb[45].mxu1  ;;  %v1346_v40 = vmul.f32 %v1308_v44, %v4091_v9  ;;  %3379 = vmatprep.subr.bf16.mxu1 %v3378_v14 }
 0x5c4   :  { %v1322_v32 = vadd.f32 %v1321_v0, %v1307_v29  ;;  %v1345_v26 = vmul.f32 %v1307_v29, %v4095_v25  ;;  %v1359_v1 = vadd.f32 %v1358_v28, %v1344_v22  ;;  %v4111_v36 = vadd.f32 %v4008_v18, %v1278_v35 }
 0x5c5   :  { %v1310_v38 = vmul.f32 0.0, %v4107_v7 }
 0x5c6   :  { %v1360_v43 = vadd.f32 %v1359_v1, %v1345_v26  ;;  %v1309_v41 = vmul.f32 0.0, %v4111_v36  ;;  %v1323_v46 = vadd.f32 %v1322_v32, %v1308_v44  ;;  %v2922_v39 = vpop.f32.mrb[46].mxu1  ;;  %3381 = vmatpush3.bf16.msra.mxu1 %v3378_v14 }
 0x5c7   :  { %v4123_v47 = vadd.f32 %v2922_v39, %v4008_v18  ;;  %v1288_v52 = vpop.f32.mrb[47].mxu1  ;;  %v1348_v57 = vmul.f32 %v1310_v38, %v4107_v7 }
 0x5c8   :  { %v1324_v53 = vadd.f32 %v1323_v46, %v1309_v41  ;;  %v1347_v54 = vmul.f32 %v1309_v41, %v4111_v36  ;;  %v1361_v55 = vadd.f32 %v1360_v43, %v1346_v40  ;;  %v1289_v56 = vadd.f32 %v4008_v18, %v1288_v52 }
 0x5c9   :  { %v1312_v60 = vmul.f32 0.0, %v4123_v47 }
 0x5ca   :  { %v1362_v59 = vadd.f32 %v1361_v55, %v1347_v54  ;;  %v1311_v62 = vmul.f32 0.0, %v1289_v56  ;;  %v1325_v63 = vadd.f32 %v1324_v53, %v1310_v38 }
 0x5cb   :  { %v1350_v8 = vmul.f32 %v1312_v60, %v4123_v47 }
 0x5cc   :  { %v1326_v4 = vadd.f32 %v1325_v63, %v1311_v62  ;;  %v1349_v18 = vmul.f32 %v1311_v62, %v1289_v56  ;;  %v1363_v6 = vadd.f32 %v1362_v59, %v1348_v57 }
 0x5ce   :  { %v1327_v10 = vadd.f32 %v1326_v4, %v1312_v60  ;;  %v1364_v13 = vadd.f32 %v1363_v6, %v1349_v18 }
 0x5d0   :  { %v1328_v16 = vrot.slane %v1327_v10, 4  ;;  %v1365_v17 = vadd.f32 %v1364_v13, %v1350_v8 }
 0x5d2   :  { %v1329_v19 = vadd.f32 %v1328_v16, %v1327_v10  ;;  %v1366_v23 = vrot.slane %v1365_v17, 4 }
 0x5d4   :  { %v1330_v24 = vrot.slane %v1329_v19, 2  ;;  %v1367_v15 = vadd.f32 %v1366_v23, %v1365_v17 }
 0x5d6   :  { %v1331_v42 = vadd.f32 %v1330_v24, %v1329_v19  ;;  %v1368_v22 = vrot.slane %v1367_v15, 2 }
 0x5d8   :  { %v1332_v27 = vrot.slane %v1331_v42, 1  ;;  %v1369_v28 = vadd.f32 %v1368_v22, %v1367_v15 }
 0x5da   :  { %v1333_v44 = vadd.f32 %v1332_v27, %v1331_v42  ;;  %v1370_v29 = vrot.slane %v1369_v28, 1 }
 0x5dc   :  { %v4136_v0 = vmul.f32 0.0625, %v1333_v44  ;;  %v1371_v12 = vadd.f32 %v1370_v29, %v1369_v28 }
 0x5de   :  { %v1372_v33 = vmul.f32 0.0625, %v1371_v12  ;;  %v1373_v34 = vmul.f32 %v4136_v0, %v4136_v0  ;;  %v1389_v35 = vsub.f32 %v1289_v56, %v4136_v0  ;;  %v1375_v32 = vsub.f32 %v4014_v21, %v4136_v0 }
 0x5df   :  { %v1376_v26 = vsub.f32 %v4011_v11, %v4136_v0  ;;  %v1377_v1 = vsub.f32 %v4026_v5, %v4136_v0  ;;  %v1378_v38 = vsub.f32 %v4023_v31, %v4136_v0  ;;  %v1379_v20 = vsub.f32 %v4035_v30, %v4136_v0 }
 0x5e0   :  { %v1374_v40 = vsub.f32 %v1372_v33, %v1373_v34  ;;  %v1380_v43 = vsub.f32 %v4031_v3, %v4136_v0  ;;  %v1381_v41 = vsub.f32 %v4063_v50, %v4136_v0  ;;  %v1382_v21 = vsub.f32 %v4059_v48, %v4136_v0 }
 0x5e1   :  { %v1383_v11 = vsub.f32 %v4079_v2, %v4136_v0  ;;  %v1384_v5 = vsub.f32 %v4075_v61, %v4136_v0  ;;  %v1385_v31 = vsub.f32 %v4095_v25, %v4136_v0  ;;  %v1386_v30 = vsub.f32 %v4091_v9, %v4136_v0  ;;  %v2239_v61 = vld [vmem:[%s4455_s5 + $0xa] ss:$0 sm:$0xff] }
 0x5e2   :  { %v1391_v46 = vadd.f32 1e-05, %v1374_v40  ;;  %v1387_v3 = vsub.f32 %v4111_v36, %v4136_v0  ;;  %v1388_v50 = vsub.f32 %v4107_v7, %v4136_v0  ;;  %v1390_v48 = vsub.f32 %v4123_v47, %v4136_v0  ;;  %v4177_v36 = vld [vmem:[%s4455_s5 + $0xb] ss:$0 sm:$0xff] }
 0x5e4   :  { %3446 = vrsqrt.f32 %v1391_v46 }
 0x5ee   :  { %v3447_v2 = vpop.eup %3446 }
 0x5ef   :  { %v1407_v25 = vmul.f32 %v3447_v2, %v1389_v35  ;;  %v1393_v39 = vmul.f32 %v3447_v2, %v1375_v32  ;;  %v1394_v49 = vmul.f32 %v3447_v2, %v1376_v26  ;;  %v1395_v9 = vmul.f32 %v3447_v2, %v1377_v1 }
 0x5f0   :  { %v1396_v45 = vmul.f32 %v3447_v2, %v1378_v38  ;;  %v1397_v7 = vmul.f32 %v3447_v2, %v1379_v20  ;;  %v1398_v52 = vmul.f32 %v3447_v2, %v1380_v43  ;;  %v1399_v53 = vmul.f32 %v3447_v2, %v1381_v41 }
 0x5f1   :  { %v1414_v47 = vmul.f32 %v2239_v61, %v1393_v39  ;;  %v1415_v54 = vmul.f32 %v2239_v61, %v1394_v49  ;;  %v1416_v55 = vmul.f32 %v2239_v61, %v1395_v9  ;;  %v1400_v56 = vmul.f32 %v3447_v2, %v1382_v21 }
 0x5f2   :  { %v1417_v57 = vmul.f32 %v2239_v61, %v1396_v45  ;;  %v1418_v58 = vmul.f32 %v2239_v61, %v1397_v7  ;;  %v1419_v59 = vmul.f32 %v2239_v61, %v1398_v52  ;;  %v1420_v60 = vmul.f32 %v2239_v61, %v1399_v53 }
 0x5f3   :  { %v1435_v62 = vadd.f32 %v4177_v36, %v1414_v47  ;;  %v1436_v63 = vadd.f32 %v4177_v36, %v1415_v54  ;;  %v1437_v37 = vadd.f32 %v4177_v36, %v1416_v55  ;;  %v1421_v51 = vmul.f32 %v2239_v61, %v1400_v56  ;;  %v3452_v54 = vld [vmem:[#allocation2 + $0x10] sm:$0xff]  ;;  %v3453_v55 = vld [vmem:[#allocation2 + $0x18] sm:$0xff]  ;;  %v3454_v56 = vld [vmem:[#allocation2 + $0x20] sm:$0xff] }
 0x5f4   :  { %v1438_v4 = vadd.f32 %v4177_v36, %v1417_v57  ;;  %v1439_v18 = vadd.f32 %v4177_v36, %v1418_v58  ;;  %v1440_v6 = vadd.f32 %v4177_v36, %v1419_v59  ;;  %v1441_v8 = vadd.f32 %v4177_v36, %v1420_v60  ;;  %v3455_v57 = vld [vmem:[#allocation2 + $0x28] sm:$0xff]  ;;  %v3456_v58 = vld [vmem:[#allocation2 + $0x30] sm:$0xff]  ;;  %v3457_v59 = vld [vmem:[#allocation2 + $0x38] sm:$0xff] }
 0x5f5   :  { %v1451_v10 = vmax.f32 %v1435_v62, 0.0  ;;  %v1452_v13 = vmax.f32 %v1436_v63, 0.0  ;;  %v1453_v14 = vmax.f32 %v1437_v37, 0.0  ;;  %v1442_v16 = vadd.f32 %v4177_v36, %v1421_v51  ;;  %v3458_v60 = vld [vmem:[#allocation2 + $0x40] sm:$0xff]  ;;  %v3459_v62 = vld [vmem:[#allocation2 + $0x48] sm:$0xff]  ;;  %v3460_v63 = vld [vmem:[#allocation2 + $0x50] sm:$0xff] }
 0x5f6   :  { %v1454_v17 = vmax.f32 %v1438_v4, 0.0  ;;  %v1455_v19 = vmax.f32 %v1439_v18, 0.0  ;;  %v1456_v23 = vmax.f32 %v1440_v6, 0.0  ;;  %v1457_v24 = vmax.f32 %v1441_v8, 0.0  ;;  %v3461_v37 = vld [vmem:[#allocation2 + $0x58] sm:$0xff]  ;;  %v3462_v51 = vld [vmem:[#allocation2 + $0x60] sm:$0xff] }
 0x5f7   :  { %v3318_v15 = vpack.c.bf16 %v1452_v13, %v1451_v10  ;;  %v1458_v42 = vmax.f32 %v1442_v16, 0.0  ;;  %v1401_v22 = vmul.f32 %v3447_v2, %v1383_v11  ;;  %v1402_v27 = vmul.f32 %v3447_v2, %v1384_v5  ;;  %v3463_v4 = vld [vmem:[#allocation2 + $0x68] sm:$0xff]  ;;  %v3464_v18 = vld [vmem:[#allocation2 + $0x70] sm:$0xff]  ;;  %v3465_v6 = vld [vmem:[#allocation2 + $0x78] sm:$0xff] }
 0x5f8   :  { %v3322_v28 = vpack.c.bf16 %v1454_v17, %v1453_v14  ;;  %v3326_v44 = vpack.c.bf16 %v1456_v23, %v1455_v19  ;;  %v1403_v29 = vmul.f32 %v3447_v2, %v1385_v31  ;;  %v1404_v0 = vmul.f32 %v3447_v2, %v1386_v30  ;;  %v2260_v8 = vld [vmem:[%s4454_s4 + $0x100] sm:$0xff]  ;;  %v2261_v10 = vld [vmem:[%s4454_s4 + $0x108] sm:$0xff]  ;;  %v2262_v13 = vld [vmem:[%s4454_s4 + $0x110] sm:$0xff] }
 0x5f9   :  { %3319 = vmatprep.subr.bf16.mxu0 %v3318_v15  ;;  %v3330_v12 = vpack.c.bf16 %v1458_v42, %v1457_v24  ;;  %v1422_v33 = vmul.f32 %v2239_v61, %v1401_v22  ;;  %v1423_v34 = vmul.f32 %v2239_v61, %v1402_v27  ;;  %v1405_v35 = vmul.f32 %v3447_v2, %v1387_v3  ;;  %v2263_v16 = vld [vmem:[%s4454_s4 + $0x118] sm:$0xff]  ;;  %v2264_v19 = vld [vmem:[%s4454_s4 + $0x120] sm:$0xff]  ;;  %v2265_v23 = vld [vmem:[%s4454_s4 + $0x128] sm:$0xff] }
 0x5fa   :  { %3321 = vmatpush3.bf16.msra.mxu0 %v3318_v15  ;;  %v1424_v32 = vmul.f32 %v2239_v61, %v1403_v29  ;;  %v1425_v26 = vmul.f32 %v2239_v61, %v1404_v0  ;;  %v1406_v1 = vmul.f32 %v3447_v2, %v1388_v50  ;;  %v1408_v38 = vmul.f32 %v3447_v2, %v1390_v48  ;;  %v2266_v15 = vld [vmem:[%s4454_s4 + $0x130] sm:$0xff]  ;;  %v2267_v42 = vld [vmem:[%s4454_s4 + $0x138] sm:$0xff]  ;;  %v2268_v27 = vld [vmem:[%s4454_s4 + $0x140] sm:$0xff] }
 0x5fb   :  { %3323 = vmatprep.subr.bf16.mxu0 %v3322_v28  ;;  %v1443_v20 = vadd.f32 %v4177_v36, %v1422_v33  ;;  %v1444_v40 = vadd.f32 %v4177_v36, %v1423_v34  ;;  %v1426_v43 = vmul.f32 %v2239_v61, %v1405_v35  ;;  %v1428_v41 = vmul.f32 %v2239_v61, %v1407_v25  ;;  %v2270_v29 = vld [vmem:[%s4454_s4 + $0x150] sm:$0xff]  ;;  %v2271_v0 = vld [vmem:[%s4454_s4 + $0x158] sm:$0xff]  ;;  %v2272_v33 = vld [vmem:[%s4454_s4 + $0x160] sm:$0xff] }
 0x5fc   :  { %v1445_v21 = vadd.f32 %v4177_v36, %v1424_v32  ;;  %v1446_v11 = vadd.f32 %v4177_v36, %v1425_v26  ;;  %v1427_v5 = vmul.f32 %v2239_v61, %v1406_v1  ;;  %v1429_v31 = vmul.f32 %v2239_v61, %v1408_v38  ;;  %v2273_v34 = vld [vmem:[%s4454_s4 + $0x168] sm:$0xff] }
 0x5fd   :  { %v1459_v30 = vmax.f32 %v1443_v20, 0.0  ;;  %v1460_v46 = vmax.f32 %v1444_v40, 0.0  ;;  %v1447_v3 = vadd.f32 %v4177_v36, %v1426_v43  ;;  %v1449_v50 = vadd.f32 %v4177_v36, %v1428_v41 }
 0x5fe   :  { %3325 = vmatpush3.bf16.msra.mxu0 %v3322_v28  ;;  %v1461_v48 = vmax.f32 %v1445_v21, 0.0  ;;  %v1462_v2 = vmax.f32 %v1446_v11, 0.0  ;;  %v1448_v39 = vadd.f32 %v4177_v36, %v1427_v5  ;;  %v1450_v49 = vadd.f32 %v4177_v36, %v1429_v31  ;;  %v3451_v36 = vld [vmem:[#allocation2 + $0x8] sm:$0xff] }
 0x5ff   :  { %3327 = vmatprep.subr.bf16.mxu0 %v3326_v44  ;;  %v3334_v25 = vpack.c.bf16 %v1460_v46, %v1459_v30  ;;  %v1463_v9 = vmax.f32 %v1447_v3, 0.0  ;;  %v1465_v45 = vmax.f32 %v1449_v50, 0.0  ;;  %v3382_v14 = vpack.c.bf16 %v2261_v10, %v2260_v8  ;;  %v2269_v28 = vld [vmem:[%s4454_s4 + $0x148] sm:$0xff] }
 0x600   :  { %v3338_v7 = vpack.c.bf16 %v1462_v2, %v1461_v48  ;;  %v1464_v52 = vmax.f32 %v1448_v39, 0.0  ;;  %v1466_v61 = vmax.f32 %v1450_v49, 0.0  ;;  %v3386_v17 = vpack.c.bf16 %v2263_v16, %v2262_v13  ;;  %v2274_v48 = vld [vmem:[%s4454_s4 + $0x170] sm:$0xff]  ;;  %v2275_v2 = vld [vmem:[%s4454_s4 + $0x178] sm:$0xff] }
 0x601   :  { %v3390_v24 = vpack.c.bf16 %v2265_v23, %v2264_v19  ;;  %v3394_v22 = vpack.c.bf16 %v2267_v42, %v2266_v15  ;;  %v3406_v35 = vpack.c.bf16 %v2273_v34, %v2272_v33  ;;  %v3410_v39 = vpack.c.bf16 %v2275_v2, %v2274_v48  ;;  %v2259_v49 = vld [vmem:[%s4455_s5 + $0x10] ss:$0 sm:$0xff] }
 0x602   :  { %3329 = vmatpush3.bf16.msra.mxu0 %v3326_v44  ;;  %v3342_v53 = vpack.c.bf16 %v1464_v52, %v1463_v9  ;;  %v3346_v47 = vpack.c.bf16 %v1466_v61, %v1465_v45  ;;  %v3398_v44 = vpack.c.bf16 %v2269_v28, %v2268_v27 }
 0x603   :  { %3331 = vmatprep.subr.bf16.mxu0 %v3330_v12 }
 0x606   :  { %3333 = vmatpush3.bf16.msra.mxu0 %v3330_v12  ;;  %v3402_v12 = vpack.c.bf16 %v2271_v0, %v2270_v29 }
 0x607   :  { %3335 = vmatprep.subr.bf16.mxu0 %v3334_v25 }
 0x60a   :  { %3337 = vmatpush3.bf16.msra.mxu0 %v3334_v25 }
 0x60b   :  { %3339 = vmatprep.subr.bf16.mxu0 %v3338_v7 }
 0x60e   :  { %3341 = vmatpush3.bf16.msra.mxu0 %v3338_v7 }
 0x60f   :  { %3343 = vmatprep.subr.bf16.mxu0 %v3342_v53 }
 0x612   :  { %3345 = vmatpush3.bf16.msra.mxu0 %v3342_v53 }
 0x613   :  { %3347 = vmatprep.subr.bf16.mxu0 %v3346_v47 }
 0x616   :  { %3349 = vmatpush3.bf16.msra.mxu0 %v3346_v47 }
 0x617   :  { %3383 = vmatprep.subr.bf16.mxu0 %v3382_v14 }
 0x619   :  { %2956 = vmatmul.mubr.f32.vlgmr.msra.gmra.mrb[48].mxu0 %v3451_v36 }
 0x61a   :  { %2958 = vmatprep.mubr.f32.mxu0 %v3452_v54  ;;  %3385 = vmatpush3.bf16.msra.mxu0 %v3382_v14 }
 0x61b   :  { %3387 = vmatprep.subr.bf16.mxu0 %v3386_v17 }
 0x61d   :  { %2959 = vmatmul.mubr.f32.gmra.mrb[50].mxu0 %v3453_v55 }
 0x61e   :  { %2961 = vmatprep.mubr.f32.mxu0 %v3454_v56  ;;  %3389 = vmatpush3.bf16.msra.mxu0 %v3386_v17 }
 0x61f   :  { %3391 = vmatprep.subr.bf16.mxu0 %v3390_v24 }
 0x621   :  { %2962 = vmatmul.mubr.f32.gmra.mrb[52].mxu0 %v3455_v57 }
 0x622   :  { %2964 = vmatprep.mubr.f32.mxu0 %v3456_v58  ;;  %3393 = vmatpush3.bf16.msra.mxu0 %v3390_v24 }
 0x623   :  { %3395 = vmatprep.subr.bf16.mxu0 %v3394_v22 }
 0x625   :  { %2965 = vmatmul.mubr.f32.gmra.mrb[54].mxu0 %v3457_v59 }
 0x626   :  { %2967 = vmatprep.mubr.f32.mxu0 %v3458_v60  ;;  %3397 = vmatpush3.bf16.msra.mxu0 %v3394_v22 }
 0x627   :  { %3399 = vmatprep.subr.bf16.mxu0 %v3398_v44 }
 0x629   :  { %2968 = vmatmul.mubr.f32.gmra.mrb[56].mxu0 %v3459_v62 }
 0x62a   :  { %2970 = vmatprep.mubr.f32.mxu0 %v3460_v63  ;;  %3401 = vmatpush3.bf16.msra.mxu0 %v3398_v44 }
 0x62b   :  { %3403 = vmatprep.subr.bf16.mxu0 %v3402_v12 }
 0x62d   :  { %2971 = vmatmul.mubr.f32.gmra.mrb[58].mxu0 %v3461_v37 }
 0x62e   :  { %2973 = vmatprep.mubr.f32.mxu0 %v3462_v51  ;;  %3405 = vmatpush3.bf16.msra.mxu0 %v3402_v12 }
 0x62f   :  { %3407 = vmatprep.subr.bf16.mxu0 %v3406_v35 }
 0x631   :  { %2974 = vmatmul.mubr.f32.gmra.mrb[60].mxu0 %v3463_v4 }
 0x632   :  { %2976 = vmatprep.mubr.f32.mxu0 %v3464_v18  ;;  %3409 = vmatpush3.bf16.msra.mxu0 %v3406_v35 }
 0x633   :  { %3411 = vmatprep.subr.bf16.mxu0 %v3410_v39 }
 0x635   :  { %2977 = vmatmul.mubr.f32.gmra.mrb[62].mxu0 %v3465_v6 }
 0x636   :  { %3413 = vmatpush3.bf16.msra.mxu0 %v3410_v39 }
 0x6ec   :  { %v2957_v32 = vpop.f32.mrb[48].mxu0 }
 0x6ed   :  { %v1533_v26 = vpop.f32.mrb[49].mxu0 }
 0x6ee   :  { %3011 = vmatprep.mubr.f32.mxu1 %v1533_v26 }
 0x6ef   :  { %3012 = vmatmul.mubr.f32.vlgmr.msra.gmra.mrb[48].mxu1 %v2957_v32 }
 0x6f0   :  { %v2960_v1 = vpop.f32.mrb[50].mxu0 }
 0x6f1   :  { %v1543_v38 = vpop.f32.mrb[51].mxu0 }
 0x6f2   :  { %3014 = vmatprep.mubr.f32.mxu1 %v1543_v38 }
 0x6f3   :  { %3015 = vmatmul.mubr.f32.gmra.mrb[50].mxu1 %v2960_v1 }
 0x6f4   :  { %v2963_v20 = vpop.f32.mrb[52].mxu0 }
 0x6f5   :  { %v1553_v40 = vpop.f32.mrb[53].mxu0 }
 0x6f6   :  { %3017 = vmatprep.mubr.f32.mxu1 %v1553_v40  ;;  %v3495_v40 = vmov 0.0  }
 0x6f7   :  { %3018 = vmatmul.mubr.f32.gmra.mrb[52].mxu1 %v2963_v20  ;;  %v3493_v20 = vmov 0.0|0.0  }
 0x6f8   :  { %v2966_v43 = vpop.f32.mrb[54].mxu0  ;;  %3414 = vmatprep.subr.bf16.mxu1 %v3493_v20 }
 0x6f9   :  { %v1563_v41 = vpop.f32.mrb[55].mxu0 }
 0x6fa   :  { %3020 = vmatprep.mubr.f32.mxu1 %v1563_v41 }
 0x6fb   :  { %3021 = vmatmul.mubr.f32.gmra.mrb[54].mxu1 %v2966_v43  ;;  %v4250_v43 = vld [vmem:[%s4455_s5 + $0x11] ss:$0 sm:$0xff] }
 0x6fc   :  { %v2969_v21 = vpop.f32.mrb[56].mxu0 }
 0x6fd   :  { %v1573_v11 = vpop.f32.mrb[57].mxu0 }
 0x6fe   :  { %3023 = vmatprep.mubr.f32.mxu1 %v1573_v11 }
 0x6ff   :  { %3024 = vmatmul.mubr.f32.gmra.mrb[56].mxu1 %v2969_v21 }
 0x700   :  { %v2972_v5 = vpop.f32.mrb[58].mxu0 }
 0x701   :  { %v1583_v31 = vpop.f32.mrb[59].mxu0 }
 0x702   :  { %3026 = vmatprep.mubr.f32.mxu1 %v1583_v31 }
 0x703   :  { %3027 = vmatmul.mubr.f32.gmra.mrb[58].mxu1 %v2972_v5 }
 0x704   :  { %v2975_v30 = vpop.f32.mrb[60].mxu0 }
 0x705   :  { %v1593_v46 = vpop.f32.mrb[61].mxu0 }
 0x706   :  { %3029 = vmatprep.mubr.f32.mxu1 %v1593_v46 }
 0x707   :  { %3030 = vmatmul.mubr.f32.gmra.mrb[60].mxu1 %v2975_v30 }
 0x708   :  { %v2978_v3 = vpop.f32.mrb[62].mxu0 }
 0x709   :  { %v1603_v50 = vpop.f32.mrb[63].mxu0 }
 0x70a   :  { %3032 = vmatprep.mubr.f32.mxu1 %v1603_v50 }
 0x70b   :  { %3033 = vmatmul.mubr.f32.gmra.mrb[62].mxu1 %v2978_v3 }
 0x70c   :  { %3123 = vmatprep.mubr.msk.f32.mxu1 %vm3494_vm0, %v3495_v40 }
 0x7c2   :  { %v3013_v25 = vpop.f32.mrb[48].mxu1 }
 0x7c3   :  { %v1707_v9 = vadd.f32 %v3013_v25, %v2259_v49  ;;  %v1701_v45 = vpop.f32.mrb[49].mxu1 }
 0x7c4   :  { %v1702_v7 = vadd.f32 %v2259_v49, %v1701_v45 }
 0x7c5   :  { %v1781_v53 = vmax.f32 %v1707_v9, 0.0 }
 0x7c6   :  { %v1780_v52 = vmax.f32 %v1702_v7, 0.0  ;;  %v3016_v61 = vpop.f32.mrb[50].mxu1 }
 0x7c7   :  { %v1717_v47 = vadd.f32 %v3016_v61, %v2259_v49  ;;  %v1711_v36 = vpop.f32.mrb[51].mxu1 }
 0x7c8   :  { %v1712_v54 = vadd.f32 %v2259_v49, %v1711_v36  ;;  %3067 = vmatprep.mubr.f32.mxu0 %v1780_v52 }
 0x7c9   :  { %3068 = vmatmul.mubr.f32.vlgmr.msra.gmra.mrb[64].mxu0 %v1781_v53  ;;  %v1783_v57 = vmax.f32 %v1717_v47, 0.0 }
 0x7ca   :  { %v1782_v55 = vmax.f32 %v1712_v54, 0.0  ;;  %v3019_v56 = vpop.f32.mrb[52].mxu1 }
 0x7cb   :  { %v1727_v58 = vadd.f32 %v3019_v56, %v2259_v49  ;;  %v1721_v59 = vpop.f32.mrb[53].mxu1 }
 0x7cc   :  { %v1722_v60 = vadd.f32 %v2259_v49, %v1721_v59  ;;  %3070 = vmatprep.mubr.f32.mxu0 %v1782_v55 }
 0x7cd   :  { %3071 = vmatmul.mubr.f32.gmra.mrb[66].mxu0 %v1783_v57  ;;  %v1785_v37 = vmax.f32 %v1727_v58, 0.0 }
 0x7ce   :  { %v1784_v62 = vmax.f32 %v1722_v60, 0.0  ;;  %v3022_v63 = vpop.f32.mrb[54].mxu1 }
 0x7cf   :  { %v1737_v51 = vadd.f32 %v3022_v63, %v2259_v49  ;;  %v1731_v4 = vpop.f32.mrb[55].mxu1 }
 0x7d0   :  { %v1732_v18 = vadd.f32 %v2259_v49, %v1731_v4  ;;  %3073 = vmatprep.mubr.f32.mxu0 %v1784_v62 }
 0x7d1   :  { %3074 = vmatmul.mubr.f32.gmra.mrb[68].mxu0 %v1785_v37  ;;  %v1787_v10 = vmax.f32 %v1737_v51, 0.0 }
 0x7d2   :  { %v1786_v6 = vmax.f32 %v1732_v18, 0.0  ;;  %v3025_v8 = vpop.f32.mrb[56].mxu1 }
 0x7d3   :  { %v1747_v13 = vadd.f32 %v3025_v8, %v2259_v49  ;;  %v1741_v14 = vpop.f32.mrb[57].mxu1 }
 0x7d4   :  { %v1742_v16 = vadd.f32 %v2259_v49, %v1741_v14  ;;  %3076 = vmatprep.mubr.f32.mxu0 %v1786_v6 }
 0x7d5   :  { %3077 = vmatmul.mubr.f32.gmra.mrb[70].mxu0 %v1787_v10  ;;  %v1789_v23 = vmax.f32 %v1747_v13, 0.0 }
 0x7d6   :  { %v1788_v17 = vmax.f32 %v1742_v16, 0.0  ;;  %v3028_v19 = vpop.f32.mrb[58].mxu1 }
 0x7d7   :  { %v1757_v24 = vadd.f32 %v3028_v19, %v2259_v49  ;;  %v1751_v15 = vpop.f32.mrb[59].mxu1 }
 0x7d8   :  { %v1752_v42 = vadd.f32 %v2259_v49, %v1751_v15  ;;  %3079 = vmatprep.mubr.f32.mxu0 %v1788_v17 }
 0x7d9   :  { %3080 = vmatmul.mubr.f32.gmra.mrb[72].mxu0 %v1789_v23  ;;  %v1791_v28 = vmax.f32 %v1757_v24, 0.0 }
 0x7da   :  { %v1790_v22 = vmax.f32 %v1752_v42, 0.0  ;;  %v3031_v27 = vpop.f32.mrb[60].mxu1 }
 0x7db   :  { %v1767_v44 = vadd.f32 %v3031_v27, %v2259_v49  ;;  %v1761_v29 = vpop.f32.mrb[61].mxu1 }
 0x7dc   :  { %v1762_v0 = vadd.f32 %v2259_v49, %v1761_v29  ;;  %3082 = vmatprep.mubr.f32.mxu0 %v1790_v22 }
 0x7dd   :  { %3083 = vmatmul.mubr.f32.gmra.mrb[74].mxu0 %v1791_v28  ;;  %v1793_v34 = vmax.f32 %v1767_v44, 0.0 }
 0x7de   :  { %v1792_v12 = vmax.f32 %v1762_v0, 0.0  ;;  %v3034_v33 = vpop.f32.mrb[62].mxu1 }
 0x7df   :  { %v1777_v35 = vadd.f32 %v3034_v33, %v2259_v49  ;;  %v1771_v32 = vpop.f32.mrb[63].mxu1 }
 0x7e0   :  { %v1772_v26 = vadd.f32 %v2259_v49, %v1771_v32  ;;  %3085 = vmatprep.mubr.f32.mxu0 %v1792_v12 }
 0x7e1   :  { %3086 = vmatmul.mubr.f32.gmra.mrb[76].mxu0 %v1793_v34  ;;  %v1795_v38 = vmax.f32 %v1777_v35, 0.0 }
 0x7e2   :  { %v1794_v1 = vmax.f32 %v1772_v26, 0.0 }
 0x7e4   :  { %3088 = vmatprep.mubr.f32.mxu0 %v1794_v1 }
 0x7e5   :  { %3089 = vmatmul.mubr.f32.gmra.mrb[78].mxu0 %v1795_v38 }
 0x89c   :  { %v3069_v41 = vpop.f32.mrb[64].mxu0 }
 0x89d   :  { %v4253_v21 = vadd.f32 %v3069_v41, %v4250_v43  ;;  %v1884_v11 = vpop.f32.mrb[65].mxu0 }
 0x89e   :  { %v4256_v5 = vadd.f32 %v4250_v43, %v1884_v11 }
 0x89f   :  { %v2002_v31 = vmul.f32 %v4253_v21, %v4253_v21 }
 0x8a0   :  { %v1979_v30 = vadd.f32 %v4253_v21, %v4256_v5  ;;  %v2001_v46 = vmul.f32 %v4256_v5, %v4256_v5  ;;  %v3072_v3 = vpop.f32.mrb[66].mxu0 }
 0x8a1   :  { %v4265_v50 = vadd.f32 %v3072_v3, %v4250_v43  ;;  %v1894_v48 = vpop.f32.mrb[67].mxu0 }
 0x8a2   :  { %v2017_v2 = vadd.f32 %v2002_v31, %v2001_v46  ;;  %v4268_v39 = vadd.f32 %v4250_v43, %v1894_v48 }
 0x8a3   :  { %v1966_v49 = vmul.f32 0.0, %v4265_v50 }
 0x8a4   :  { %v1965_v25 = vmul.f32 0.0, %v4268_v39  ;;  %v3075_v9 = vpop.f32.mrb[68].mxu0 }
 0x8a5   :  { %v4273_v45 = vadd.f32 %v3075_v9, %v4250_v43  ;;  %v1904_v7 = vpop.f32.mrb[69].mxu0  ;;  %v2004_v36 = vmul.f32 %v1966_v49, %v4265_v50 }
 0x8a6   :  { %v1980_v52 = vadd.f32 %v1979_v30, %v1965_v25  ;;  %v2003_v61 = vmul.f32 %v1965_v25, %v4268_v39  ;;  %v4277_v53 = vadd.f32 %v4250_v43, %v1904_v7 }
 0x8a7   :  { %v1968_v47 = vmul.f32 0.0, %v4273_v45 }
 0x8a8   :  { %v2018_v54 = vadd.f32 %v2017_v2, %v2003_v61  ;;  %v1967_v55 = vmul.f32 0.0, %v4277_v53  ;;  %v1981_v56 = vadd.f32 %v1980_v52, %v1966_v49  ;;  %v3078_v57 = vpop.f32.mrb[70].mxu0 }
 0x8a9   :  { %v4283_v58 = vadd.f32 %v3078_v57, %v4250_v43  ;;  %v1914_v59 = vpop.f32.mrb[71].mxu0  ;;  %v2006_v51 = vmul.f32 %v1968_v47, %v4273_v45 }
 0x8aa   :  { %v1982_v60 = vadd.f32 %v1981_v56, %v1967_v55  ;;  %v2005_v62 = vmul.f32 %v1967_v55, %v4277_v53  ;;  %v2019_v63 = vadd.f32 %v2018_v54, %v2004_v36  ;;  %v4287_v37 = vadd.f32 %v4250_v43, %v1914_v59 }
 0x8ab   :  { %v1970_v18 = vmul.f32 0.0, %v4283_v58 }
 0x8ac   :  { %v2020_v4 = vadd.f32 %v2019_v63, %v2005_v62  ;;  %v1969_v6 = vmul.f32 0.0, %v4287_v37  ;;  %v1983_v8 = vadd.f32 %v1982_v60, %v1968_v47  ;;  %v3081_v10 = vpop.f32.mrb[72].mxu0 }
 0x8ad   :  { %v4293_v13 = vadd.f32 %v3081_v10, %v4250_v43  ;;  %v1924_v14 = vpop.f32.mrb[73].mxu0  ;;  %v2008_v15 = vmul.f32 %v1970_v18, %v4283_v58 }
 0x8ae   :  { %v1984_v16 = vadd.f32 %v1983_v8, %v1969_v6  ;;  %v2007_v17 = vmul.f32 %v1969_v6, %v4287_v37  ;;  %v2021_v19 = vadd.f32 %v2020_v4, %v2006_v51  ;;  %v4297_v23 = vadd.f32 %v4250_v43, %v1924_v14 }
 0x8af   :  { %v1972_v24 = vmul.f32 0.0, %v4293_v13 }
 0x8b0   :  { %v2022_v42 = vadd.f32 %v2021_v19, %v2007_v17  ;;  %v1971_v22 = vmul.f32 0.0, %v4297_v23  ;;  %v1985_v27 = vadd.f32 %v1984_v16, %v1970_v18  ;;  %v3084_v28 = vpop.f32.mrb[74].mxu0 }
 0x8b1   :  { %v4303_v44 = vadd.f32 %v3084_v28, %v4250_v43  ;;  %v1934_v29 = vpop.f32.mrb[75].mxu0  ;;  %v2010_v35 = vmul.f32 %v1972_v24, %v4293_v13 }
 0x8b2   :  { %v1986_v0 = vadd.f32 %v1985_v27, %v1971_v22  ;;  %v2009_v12 = vmul.f32 %v1971_v22, %v4297_v23  ;;  %v2023_v33 = vadd.f32 %v2022_v42, %v2008_v15  ;;  %v4307_v34 = vadd.f32 %v4250_v43, %v1934_v29 }
 0x8b3   :  { %v1974_v26 = vmul.f32 0.0, %v4303_v44 }
 0x8b4   :  { %v2024_v32 = vadd.f32 %v2023_v33, %v2009_v12  ;;  %v1973_v1 = vmul.f32 0.0, %v4307_v34  ;;  %v1987_v38 = vadd.f32 %v1986_v0, %v1972_v24  ;;  %v3087_v40 = vpop.f32.mrb[76].mxu0 }
 0x8b5   :  { %v4313_v41 = vadd.f32 %v3087_v40, %v4250_v43  ;;  %v1944_v11 = vpop.f32.mrb[77].mxu0  ;;  %v2012_v2 = vmul.f32 %v1974_v26, %v4303_v44 }
 0x8b6   :  { %v1988_v31 = vadd.f32 %v1987_v38, %v1973_v1  ;;  %v2011_v30 = vmul.f32 %v1973_v1, %v4307_v34  ;;  %v2025_v46 = vadd.f32 %v2024_v32, %v2010_v35  ;;  %v4317_v3 = vadd.f32 %v4250_v43, %v1944_v11 }
 0x8b7   :  { %v1976_v48 = vmul.f32 0.0, %v4313_v41 }
 0x8b8   :  { %v2026_v49 = vadd.f32 %v2025_v46, %v2011_v30  ;;  %v1975_v25 = vmul.f32 0.0, %v4317_v3  ;;  %v1989_v9 = vadd.f32 %v1988_v31, %v1974_v26  ;;  %v3090_v7 = vpop.f32.mrb[78].mxu0 }
 0x8b9   :  { %v4323_v52 = vadd.f32 %v3090_v7, %v4250_v43  ;;  %v1954_v61 = vpop.f32.mrb[79].mxu0  ;;  %v2014_v56 = vmul.f32 %v1976_v48, %v4313_v41 }
 0x8ba   :  { %v1990_v47 = vadd.f32 %v1989_v9, %v1975_v25  ;;  %v2013_v36 = vmul.f32 %v1975_v25, %v4317_v3  ;;  %v2027_v54 = vadd.f32 %v2026_v49, %v2012_v2  ;;  %v1955_v55 = vadd.f32 %v4250_v43, %v1954_v61 }
 0x8bb   :  { %v1978_v59 = vmul.f32 0.0, %v4323_v52 }
 0x8bc   :  { %v2028_v57 = vadd.f32 %v2027_v54, %v2013_v36  ;;  %v1977_v60 = vmul.f32 0.0, %v1955_v55  ;;  %v1991_v62 = vadd.f32 %v1990_v47, %v1976_v48 }
 0x8bd   :  { %v2016_v18 = vmul.f32 %v1978_v59, %v4323_v52 }
 0x8be   :  { %v1992_v63 = vadd.f32 %v1991_v62, %v1977_v60  ;;  %v2015_v51 = vmul.f32 %v1977_v60, %v1955_v55  ;;  %v2029_v4 = vadd.f32 %v2028_v57, %v2014_v56 }
 0x8c0   :  { %v1993_v6 = vadd.f32 %v1992_v63, %v1978_v59  ;;  %v2030_v8 = vadd.f32 %v2029_v4, %v2015_v51 }
 0x8c2   :  { %v1994_v10 = vrot.slane %v1993_v6, 4  ;;  %v2031_v14 = vadd.f32 %v2030_v8, %v2016_v18 }
 0x8c4   :  { %v1995_v16 = vadd.f32 %v1994_v10, %v1993_v6  ;;  %v2032_v17 = vrot.slane %v2031_v14, 4 }
 0x8c6   :  { %v1996_v19 = vrot.slane %v1995_v16, 2  ;;  %v2033_v43 = vadd.f32 %v2032_v17, %v2031_v14 }
 0x8c8   :  { %v1997_v24 = vadd.f32 %v1996_v19, %v1995_v16  ;;  %v2034_v15 = vrot.slane %v2033_v43, 2 }
 0x8ca   :  { %v1998_v42 = vrot.slane %v1997_v24, 1  ;;  %v2035_v22 = vadd.f32 %v2034_v15, %v2033_v43 }
 0x8cc   :  { %v1999_v27 = vadd.f32 %v1998_v42, %v1997_v24  ;;  %v2036_v28 = vrot.slane %v2035_v22, 1 }
 0x8ce   :  { %v4330_v29 = vmul.f32 0.0625, %v1999_v27  ;;  %v2037_v0 = vadd.f32 %v2036_v28, %v2035_v22 }
 0x8d0   :  { %v2038_v12 = vmul.f32 0.0625, %v2037_v0  ;;  %v2039_v33 = vmul.f32 %v4330_v29, %v4330_v29  ;;  %v2055_v35 = vsub.f32 %v1955_v55, %v4330_v29  ;;  %v2041_v32 = vsub.f32 %v4256_v5, %v4330_v29 }
 0x8d1   :  { %v2042_v26 = vsub.f32 %v4253_v21, %v4330_v29  ;;  %v2043_v1 = vsub.f32 %v4268_v39, %v4330_v29  ;;  %v2044_v38 = vsub.f32 %v4265_v50, %v4330_v29  ;;  %v2045_v40 = vsub.f32 %v4277_v53, %v4330_v29 }
 0x8d2   :  { %v2040_v11 = vsub.f32 %v2038_v12, %v2039_v33  ;;  %v2046_v31 = vsub.f32 %v4273_v45, %v4330_v29  ;;  %v2047_v30 = vsub.f32 %v4287_v37, %v4330_v29  ;;  %v2048_v5 = vsub.f32 %v4283_v58, %v4330_v29 }
 0x8d3   :  { %v2049_v21 = vsub.f32 %v4297_v23, %v4330_v29  ;;  %v2050_v39 = vsub.f32 %v4293_v13, %v4330_v29  ;;  %v2051_v50 = vsub.f32 %v4307_v34, %v4330_v29  ;;  %v2052_v53 = vsub.f32 %v4303_v44, %v4330_v29  ;;  %v2279_v13 = vld [vmem:[%s4455_s5 + $0x12] ss:$0 sm:$0xff] }
 0x8d4   :  { %v2057_v46 = vadd.f32 1e-05, %v2040_v11  ;;  %v2053_v45 = vsub.f32 %v4317_v3, %v4330_v29  ;;  %v2054_v37 = vsub.f32 %v4313_v41, %v4330_v29  ;;  %v2056_v58 = vsub.f32 %v4323_v52, %v4330_v29  ;;  %v4371_v3 = vld [vmem:[%s4455_s5 + $0x13] ss:$0 sm:$0xff] }
 0x8d6   :  { %3448 = vrsqrt.f32 %v2057_v46  ;;  %v2133_v46 = vld [vmem:[%s4456_s6] sm:$0xff] }
 0x8e0   :  { %v3449_v23 = vpop.eup %3448 }
 0x8e1   :  { %v2073_v34 = vmul.f32 %v3449_v23, %v2055_v35  ;;  %v2059_v48 = vmul.f32 %v3449_v23, %v2041_v32  ;;  %v2060_v2 = vmul.f32 %v3449_v23, %v2042_v26  ;;  %v2061_v44 = vmul.f32 %v3449_v23, %v2043_v1 }
 0x8e2   :  { %v2062_v49 = vmul.f32 %v3449_v23, %v2044_v38  ;;  %v2063_v41 = vmul.f32 %v3449_v23, %v2045_v40  ;;  %v2064_v25 = vmul.f32 %v3449_v23, %v2046_v31  ;;  %v2065_v9 = vmul.f32 %v3449_v23, %v2047_v30 }
 0x8e3   :  { %v2094_v7 = vmul.f32 %v2279_v13, %v2073_v34  ;;  %v2080_v52 = vmul.f32 %v2279_v13, %v2059_v48  ;;  %v2081_v61 = vmul.f32 %v2279_v13, %v2060_v2  ;;  %v2082_v47 = vmul.f32 %v2279_v13, %v2061_v44 }
 0x8e4   :  { %v2083_v36 = vmul.f32 %v2279_v13, %v2062_v49  ;;  %v2084_v54 = vmul.f32 %v2279_v13, %v2063_v41  ;;  %v2085_v55 = vmul.f32 %v2279_v13, %v2064_v25  ;;  %v2066_v56 = vmul.f32 %v3449_v23, %v2048_v5 }
 0x8e5   :  { %v2101_v57 = vadd.f32 %v4371_v3, %v2080_v52  ;;  %v2102_v59 = vadd.f32 %v4371_v3, %v2081_v61  ;;  %v2103_v60 = vadd.f32 %v4371_v3, %v2082_v47  ;;  %v2086_v62 = vmul.f32 %v2279_v13, %v2065_v9 }
 0x8e6   :  { %v2104_v63 = vadd.f32 %v4371_v3, %v2083_v36  ;;  %v2105_v51 = vadd.f32 %v4371_v3, %v2084_v54  ;;  %v2106_v4 = vadd.f32 %v4371_v3, %v2085_v55  ;;  %v2087_v18 = vmul.f32 %v2279_v13, %v2066_v56 }
 0x8e7   :  { %2117 = vst [vmem:[%s4458_s8] sm:$0xff] %v2101_v57  ;;  %2118 = vst [vmem:[%s4458_s8 + $0x8] sm:$0xff] %v2102_v59  ;;  %v3415_v6 = vpack.c.bf16 %v2102_v59, %v2101_v57  ;;  %v2107_v8 = vadd.f32 %v4371_v3, %v2086_v62  ;;  %v2067_v10 = vmul.f32 %v3449_v23, %v2049_v21 }
 0x8e8   :  { %2119 = vst [vmem:[%s4458_s8 + $0x10] sm:$0xff] %v2103_v60  ;;  %v2068_v14 = vmul.f32 %v3449_v23, %v2050_v39  ;;  %2120 = vst [vmem:[%s4458_s8 + $0x18] sm:$0xff] %v2104_v63  ;;  %v3418_v16 = vpack.c.bf16 %v2104_v63, %v2103_v60  ;;  %v3421_v17 = vpack.c.bf16 %v2106_v4, %v2105_v51 }
 0x8e9   :  { %2121 = vst [vmem:[%s4458_s8 + $0x20] sm:$0xff] %v2105_v51  ;;  %2122 = vst [vmem:[%s4458_s8 + $0x28] sm:$0xff] %v2106_v4  ;;  %v2108_v19 = vadd.f32 %v4371_v3, %v2087_v18  ;;  %v2069_v43 = vmul.f32 %v3449_v23, %v2051_v50  ;;  %3416 = vmatpush3.bf16.msra.mxu1 %v3415_v6  ;;  %v2088_v24 = vmul.f32 %v2279_v13, %v2067_v10 }
 0x8ea   :  { %2123 = vst [vmem:[%s4458_s8 + $0x30] sm:$0xff] %v2107_v8  ;;  %v2089_v15 = vmul.f32 %v2279_v13, %v2068_v14  ;;  %v2070_v42 = vmul.f32 %v3449_v23, %v2052_v53  ;;  %v2071_v22 = vmul.f32 %v3449_v23, %v2053_v45  ;;  %3417 = vmatprep.subr.bf16.mxu1 %v3493_v20 }
 0x8eb   :  { %2124 = vst [vmem:[%s4458_s8 + $0x38] sm:$0xff] %v2108_v19  ;;  %v3424_v27 = vpack.c.bf16 %v2108_v19, %v2107_v8  ;;  %v2090_v28 = vmul.f32 %v2279_v13, %v2069_v43  ;;  %v2072_v29 = vmul.f32 %v3449_v23, %v2054_v37  ;;  %v2074_v0 = vmul.f32 %v3449_v23, %v2056_v58 }
 0x8ec   :  { %v2109_v12 = vadd.f32 %v4371_v3, %v2088_v24  ;;  %v2110_v33 = vadd.f32 %v4371_v3, %v2089_v15  ;;  %v2091_v35 = vmul.f32 %v2279_v13, %v2070_v42  ;;  %v2092_v32 = vmul.f32 %v2279_v13, %v2071_v22 }
 0x8ed   :  { %v2111_v26 = vadd.f32 %v4371_v3, %v2090_v28  ;;  %v2093_v1 = vmul.f32 %v2279_v13, %v2072_v29  ;;  %v2095_v38 = vmul.f32 %v2279_v13, %v2074_v0  ;;  %v2115_v40 = vadd.f32 %v4371_v3, %v2094_v7  ;;  %3419 = vmatpush3.bf16.msra.mxu1 %v3418_v16 }
 0x8ee   :  { %2125 = vst [vmem:[%s4458_s8 + $0x40] sm:$0xff] %v2109_v12  ;;  %2126 = vst [vmem:[%s4458_s8 + $0x48] sm:$0xff] %v2110_v33  ;;  %v3427_v11 = vpack.c.bf16 %v2110_v33, %v2109_v12  ;;  %v2112_v31 = vadd.f32 %v4371_v3, %v2091_v35  ;;  %v2113_v30 = vadd.f32 %v4371_v3, %v2092_v32  ;;  %3420 = vmatprep.subr.bf16.mxu1 %v3493_v20 }
 0x8ef   :  { %2127 = vst [vmem:[%s4458_s8 + $0x50] sm:$0xff] %v2111_v26  ;;  %v2114_v5 = vadd.f32 %v4371_v3, %v2093_v1  ;;  %v2116_v21 = vadd.f32 %v4371_v3, %v2095_v38  ;;  %2131 = vst [vmem:[%s4458_s8 + $0x70] sm:$0xff] %v2115_v40 }
 0x8f0   :  { %2128 = vst [vmem:[%s4458_s8 + $0x58] sm:$0xff] %v2112_v31  ;;  %v3430_v39 = vpack.c.bf16 %v2112_v31, %v2111_v26  ;;  %2129 = vst [vmem:[%s4458_s8 + $0x60] sm:$0xff] %v2113_v30 }
 0x8f1   :  { %2130 = vst [vmem:[%s4458_s8 + $0x68] sm:$0xff] %v2114_v5  ;;  %v3433_v50 = vpack.c.bf16 %v2114_v5, %v2113_v30  ;;  %2132 = vst [vmem:[%s4458_s8 + $0x78] sm:$0xff] %v2116_v21  ;;  %v3436_v53 = vpack.c.bf16 %v2116_v21, %v2115_v40  ;;  %3422 = vmatpush3.bf16.msra.mxu1 %v3421_v17 }
 0x8f2   :  { %3423 = vmatprep.subr.bf16.mxu1 %v3493_v20 }
 0x8f5   :  { %3425 = vmatpush3.bf16.msra.mxu1 %v3424_v27 }
 0x8f6   :  { %3426 = vmatprep.subr.bf16.mxu1 %v3493_v20 }
 0x8f9   :  { %3428 = vmatpush3.bf16.msra.mxu1 %v3427_v11 }
 0x8fa   :  { %3429 = vmatprep.subr.bf16.mxu1 %v3493_v20 }
 0x8fd   :  { %3431 = vmatpush3.bf16.msra.mxu1 %v3430_v39 }
 0x8fe   :  { %3432 = vmatprep.subr.bf16.mxu1 %v3493_v20 }
 0x901   :  { %3434 = vmatpush3.bf16.msra.mxu1 %v3433_v50 }
 0x902   :  { %3435 = vmatprep.subr.bf16.mxu1 %v3493_v20 }
 0x905   :  { %3437 = vmatpush3.bf16.msra.mxu1 %v3436_v53 }
 0x908   :  { %3124 = vmatmul.mubr.f32.vlgmr.msra.gmra.mrb[64].mxu1 %v2133_v46 }
 0x9db   :  { %v2200_v45 = vpop.f32.mrb[64].mxu1 }
 0x9dc   :  { %2204 = vst [vmem:[%s4457_s7] sm:$0xff] %v2200_v45  ;;  %v3125_v37 = vpop.f32.mrb[65].mxu1 }
 0x9dd   :  { %2213 = vsyncpa [#allocation3], 1 }

</bundles_post_ra>
